<compile_context>
chip_gen: v6e
topology: v6e:2x2x1
jax: 0.10.0
libtpu: 0.0.40
codegen_flags: <defaults>
</compile_context>

<pallas_src>
import functools

import jax
import jax.numpy as jnp
import numpy as np
from jax import lax
from jax.experimental import pallas as pl
from jax.experimental.pallas import tpu as pltpu


# ----------------------------- Pallas kernel -----------------------------
def _gcn_edge_tile_kernel(src_ref, tgt_ref, deprel_ref, deparc_ref,
                          inp_ref, gate_w_ref, w_full_ref,
                          out_ref,
                          *, align_idx, opposite_idx, self_idx, no_rel_idx,
                          num_rel):
    f32 = jnp.float32
    bf16 = jnp.bfloat16
    TE = src_ref.shape[0]          # edge tile
    N, D = inp_ref.shape
    R = num_rel

    # Output block is resident across the (arbitrary) edge axis: init once.
    @pl.when(pl.program_id(0) == 0)
    def _():
        out_ref[...] = jnp.zeros_like(out_ref)

    src = src_ref[...]             # (TE, 1) int32
    tgt = tgt_ref[...]             # (1, TE) int32
    deprel = deprel_ref[...]       # (TE, 1) int32
    deparc = deparc_ref[...]       # (TE, 1) int32

    # One-hot gather matrix S[e, n] = (src[e] == n), bf16 (0/1 exact).
    S = (lax.broadcasted_iota(jnp.int32, (TE, N), 1) == src).astype(bf16)
    # One-hot deprel matrix Rm[e, r] = (deprel[e] == r), kept f32 for VPU work.
    Rm = (lax.broadcasted_iota(jnp.int32, (TE, R), 1) == deprel).astype(f32)

    # Gather source-node features per edge: x_e[e] = inp[src[e]]  (MXU, bf16 in, f32 out)
    x_e = jnp.dot(S, inp_ref[...], preferred_element_type=f32)          # (TE, D)

    # ---- fused gate matmul: all four branch gates from ONE MXU op ----------
    # gate[:, 0]=in, 1=out, 2=self, 3=no_rel ;  rows [0:D]=gate vectors,
    # rows [D:D+R]=deprel gate biases (zeros for self / no_rel columns).
    gin = jnp.concatenate([x_e, Rm], axis=1).astype(bf16)               # (TE, D+R)
    gates = jnp.dot(gin, gate_w_ref[...], preferred_element_type=f32)   # (TE, 4)
    sg = jax.nn.sigmoid(gates)                                          # one sigmoid

    # Fold the deparc mask into the scalar gate coefficient (f32 VPU work).
    # Padded edges carry a sentinel deparc -> coefficient is exactly zero.
    c_in = sg[:, 0:1] * (deparc == align_idx).astype(f32)               # (TE, 1)
    c_out = sg[:, 1:2] * (deparc == opposite_idx).astype(f32)
    c_self = sg[:, 2:3] * (deparc == self_idx).astype(f32)
    c_norel = sg[:, 3:4] * (deparc == no_rel_idx).astype(f32)

    # ---- fused message matmul ----------------------------------------------
    # msg[e] = sum_b c_b[e] * (x_e[e] @ W_b)  +  c_in[e]*b_in[deprel[e]]
    #                                        +  c_out[e]*b_out[deprel[e]]
    # expressed as ONE (TE, 4D+2R) @ (4D+2R, D) bf16 MXU matmul.
    xw = jnp.concatenate(
        [c_in * x_e, c_out * x_e, c_self * x_e, c_norel * x_e,
         c_in * Rm, c_out * Rm], axis=1).astype(bf16)                   # (TE, 4D+2R)
    msg = jnp.dot(xw, w_full_ref[...], preferred_element_type=f32)      # (TE, D)

    # ---- scatter-add messages to target nodes (one-hot MXU matmul) ---------
    Tm = (lax.broadcasted_iota(jnp.int32, (N, TE), 0) == tgt).astype(bf16)  # (N, TE)
    out_ref[...] += jnp.dot(Tm, msg.astype(bf16), preferred_element_type=f32)


# ------------------------------- wrapper ----------------------------------
def syntactic_gcn(inp, src, tgt, deprel, deparc, params,
                  *, align_idx, opposite_idx, self_idx, no_rel_idx,
                  edge_tile=128):
    (Vin, ving, Vout, voutg, Wself, wselfg, Wnorel, wnorelg,
     b_in, b_in_g, b_out, b_out_g) = params
    N, D = inp.shape
    R = b_in.shape[0]
    E = int(src.shape[0])

    # --- pad edges to a tile multiple; sentinel deparc zeroes padded edges ---
    n_tiles = max(1, -(-E // edge_tile))
    E_pad = n_tiles * edge_tile
    pad = E_pad - E
    sentinel = min(align_idx, opposite_idx, self_idx, no_rel_idx) - 1
    i32 = jnp.int32
    src_p = jnp.concatenate([src.astype(i32), jnp.zeros((pad,), i32)])
    tgt_p = jnp.concatenate([tgt.astype(i32), jnp.zeros((pad,), i32)])
    deprel_p = jnp.concatenate([deprel.astype(i32), jnp.zeros((pad,), i32)])
    deparc_p = jnp.concatenate([deparc.astype(i32),
                                jnp.full((pad,), sentinel, i32)])
    # NOTE: out-of-range src/tgt silently drop via the one-hot (the JAX
    # reference would wrap-index) — inputs are assumed well-formed.

    # --- fuse weights (done once in plain XLA, outside the kernel) ----------
    # Gate weights: (D+R, 4); columns = [in, out, self, no_rel].
    gate_w = jnp.concatenate([
        jnp.stack([ving.reshape(-1), voutg.reshape(-1),
                   wselfg.reshape(-1), wnorelg.reshape(-1)], axis=1),    # (D, 4)
        jnp.concatenate([b_in_g.reshape(-1, 1), b_out_g.reshape(-1, 1),
                         jnp.zeros((R, 2), jnp.float32)], axis=1),       # (R, 4)
    ], axis=0).astype(jnp.bfloat16)                                      # (D+R, 4)
    # Projection weights + deprel bias tables: (4D+2R, D).
    w_full = jnp.concatenate(
        [Vin, Vout, Wself, Wnorel, b_in, b_out],
        axis=0).astype(jnp.bfloat16)                                     # (4D+2R, D)

    kernel = functools.partial(
        _gcn_edge_tile_kernel,
        align_idx=align_idx, opposite_idx=opposite_idx,
        self_idx=self_idx, no_rel_idx=no_rel_idx, num_rel=R)

    return pl.pallas_call(
        kernel,
        out_shape=jax.ShapeDtypeStruct((N, D), jnp.float32),
        grid_spec=pltpu.PrefetchScalarGridSpec(
            num_scalar_prefetch=0,
            grid=(n_tiles,),
            in_specs=[
                pl.BlockSpec((edge_tile, 1), lambda e: (e, 0)),   # src
                pl.BlockSpec((1, edge_tile), lambda e: (0, e)),   # tgt (lane-major)
                pl.BlockSpec((edge_tile, 1), lambda e: (e, 0)),   # deprel
                pl.BlockSpec((edge_tile, 1), lambda e: (e, 0)),   # deparc
                pl.BlockSpec((N, D), lambda e: (0, 0)),           # inp (bf16, resident)
                pl.BlockSpec((D + R, 4), lambda e: (0, 0)),       # fused gate weights
                pl.BlockSpec((4 * D + 2 * R, D), lambda e: (0, 0)),  # fused proj weights
            ],
            out_specs=pl.BlockSpec((N, D), lambda e: (0, 0)),     # resident accumulator
        ),
        compiler_params=pltpu.CompilerParams(
            dimension_semantics=("arbitrary",),      # edge axis is a reduction
            vmem_limit_bytes=32 * 1024 * 1024),      # safe on v5e/v6e/v7x
    )(src_p.reshape(E_pad, 1), tgt_p.reshape(1, E_pad),
      deprel_p.reshape(E_pad, 1), deparc_p.reshape(E_pad, 1),
      inp.astype(jnp.bfloat16), gate_w, w_full)


# ----------------------------- reference (JAX) -----------------------------
def syntactic_gcn_ref(inp, src, tgt, deprel, deparc, params,
                      *, align_idx, opposite_idx, self_idx, no_rel_idx):
    (Vin, ving, Vout, voutg, Wself, wselfg, Wnorel, wnorelg,
     b_in, b_in_g, b_out, b_out_g) = params
    N, D = inp.shape
    x_e = inp[src]                                         # (E, D)

    def branch(W, g, b=None, bg=None):
        h = x_e @ W
        gv = jnp.sum(x_e * g, axis=-1, keepdims=True)
        if b is not None:
            h = h + b[deprel]
            gv = gv + bg[0][deprel][:, None]
        return h * jax.nn.sigmoid(gv)

    msg = (branch(Vin, ving, b_in, b_in_g) * (deparc == align_idx)[:, None]
           + branch(Vout, voutg, b_out, b_out_g) * (deparc == opposite_idx)[:, None]
           + branch(Wself, wselfg) * (deparc == self_idx)[:, None]
           + branch(Wnorel, wnorelg) * (deparc == no_rel_idx)[:, None])
    return jnp.zeros((N, D), jnp.float32).at[tgt].add(msg)


# --------------------------------- main ------------------------------------
if __name__ == "__main__":
    key = jax.random.PRNGKey(0)
    N, D, NREL = 16, 32, 8                      # nodes, model_dim, deprel_size
    ALIGN, OPP, SELF, NOREL = 0, 1, 2, 3        # deparc vocab indices

    ks = jax.random.split(key, 16)

    # Graph: one self-loop per node plus random align/opposite/norelation edges.
    # E = 216 -> padded to 256 -> 2 edge tiles (exercises grid accumulate + padding).
    E_rand = 200
    src_r = jax.random.randint(ks[0], (E_rand,), 0, N)
    tgt_r = jax.random.randint(ks[1], (E_rand,), 0, N)
    rel_r = jax.random.randint(ks[2], (E_rand,), 0, NREL)
    arc_r = jax.random.choice(ks[3], jnp.array([ALIGN, OPP, NOREL], jnp.int32),
                              shape=(E_rand,))
    src = jnp.concatenate([jnp.arange(N, dtype=jnp.int32), src_r.astype(jnp.int32)])
    tgt = jnp.concatenate([jnp.arange(N, dtype=jnp.int32), tgt_r.astype(jnp.int32)])
    deprel = jnp.concatenate([jnp.zeros((N,), jnp.int32), rel_r.astype(jnp.int32)])
    deparc = jnp.concatenate([jnp.full((N,), SELF, jnp.int32), arc_r.astype(jnp.int32)])

    inp = jax.random.normal(ks[4], (N, D), jnp.float32)

    # Deterministic parameter init (xavier-uniform weights; b_* zeros, b_*_gate ones),
    # weights stored as (in, out) so the kernel computes x @ W (== torch Linear).
    def xavier(k, shape):
        fan_in, fan_out = shape[0], shape[1]
        lim = float(np.sqrt(6.0 / (fan_in + fan_out)))
        return jax.random.uniform(k, shape, jnp.float32, -lim, lim)

    Vin = xavier(ks[5], (D, D))
    ving = xavier(ks[6], (D, 1)).reshape(1, D)       # gate weight as row (1, D)
    Vout = xavier(ks[7], (D, D))
    voutg = xavier(ks[8], (D, 1)).reshape(1, D)
    Wself = xavier(ks[9], (D, D))
    wselfg = xavier(ks[10], (D, 1)).reshape(1, D)
    Wnorel = xavier(ks[11], (D, D))
    wnorelg = xavier(ks[12], (D, 1)).reshape(1, D)
    b_in = jnp.zeros((NREL, D), jnp.float32)
    b_in_g = jnp.ones((1, NREL), jnp.float32)        # (deprel_size, 1) stored as row
    b_out = jnp.zeros((NREL, D), jnp.float32)
    b_out_g = jnp.ones((1, NREL), jnp.float32)

    params = (Vin, ving, Vout, voutg, Wself, wselfg, Wnorel, wnorelg,
              b_in, b_in_g, b_out, b_out_g)

    idx_kwargs = dict(align_idx=ALIGN, opposite_idx=OPP,
                      self_idx=SELF, no_rel_idx=NOREL)

    out = syntactic_gcn(inp, src, tgt, deprel, deparc, params, **idx_kwargs)
    out = jax.block_until_ready(out)

    ref = syntactic_gcn_ref(inp, src, tgt, deprel, deparc, params, **idx_kwargs)
    # bf16 MXU operands in the kernel vs. pure-f32 reference -> bf16-level tolerance.
    np.testing.assert_allclose(np.asarray(out), np.asarray(ref),
                               rtol=2e-2, atol=2e-2)

    print("KERNEL_OK")
</pallas_src>

<mosaic_0001>
module attributes {stable_mosaic.version = 11 : i64} {
  func.func @_gcn_edge_tile_kernel(%arg0: i32, %arg1: memref<128x1xi32, #tpu.memory_space<vmem>>, %arg2: memref<1x128xi32, #tpu.memory_space<vmem>>, %arg3: memref<128x1xi32, #tpu.memory_space<vmem>>, %arg4: memref<128x1xi32, #tpu.memory_space<vmem>>, %arg5: memref<16x32xbf16, #tpu.memory_space<vmem>>, %arg6: memref<40x4xbf16, #tpu.memory_space<vmem>>, %arg7: memref<144x32xbf16, #tpu.memory_space<vmem>>, %arg8: memref<16x32xf32, #tpu.memory_space<vmem>>) attributes {dimension_semantics = [#tpu.dimension_semantics<arbitrary>], iteration_bounds = array<i64: 2>, scalar_prefetch = 0 : i64, scratch_operands = 0 : i64, tpu.core_type = #tpu.core_type<tc>, window_params = [{transform_indices = @transform_0, window_bounds = array<i64: 128, 1>}, {transform_indices = @transform_1, window_bounds = array<i64: 1, 128>}, {transform_indices = @transform_2, window_bounds = array<i64: 128, 1>}, {transform_indices = @transform_3, window_bounds = array<i64: 128, 1>}, {pipeline_mode = #tpu.pipeline_mode<synchronous>, transform_indices = @transform_4, window_bounds = array<i64: 16, 32>}, {pipeline_mode = #tpu.pipeline_mode<synchronous>, transform_indices = @transform_5, window_bounds = array<i64: 40, 4>}, {pipeline_mode = #tpu.pipeline_mode<synchronous>, transform_indices = @transform_6, window_bounds = array<i64: 144, 32>}, {pipeline_mode = #tpu.pipeline_mode<synchronous>, transform_indices = @transform_7, window_bounds = array<i64: 16, 32>}]} {
    %c0_i32 = arith.constant 0 : i32
    %0 = arith.cmpi eq, %arg0, %c0_i32 : i32
    %1 = arith.extui %0 : i1 to i32
    %c0_i32_0 = arith.constant 0 : i32
    %2 = arith.cmpi ne, %1, %c0_i32_0 : i32
    scf.if %2 {
      %cst_23 = arith.constant 0.000000e+00 : f32
      %80 = vector.broadcast %cst_23 : f32 to vector<16x32xf32>
      %c0_24 = arith.constant 0 : index
      %c0_25 = arith.constant 0 : index
      %81 = vector.load %arg8[%c0_24, %c0_25] : memref<16x32xf32, #tpu.memory_space<vmem>>, vector<16x32xf32>
      tpu.vector_store %arg8[%c0_24, %c0_25], %80 {strides = array<i32>} : memref<16x32xf32, #tpu.memory_space<vmem>>, vector<16x32xf32>,
    } else {
    }
    %c0 = arith.constant 0 : index
    %c0_1 = arith.constant 0 : index
    %3 = vector.load %arg1[%c0, %c0_1] : memref<128x1xi32, #tpu.memory_space<vmem>>, vector<128x1xi32>
    %c0_2 = arith.constant 0 : index
    %c0_3 = arith.constant 0 : index
    %4 = vector.load %arg2[%c0_2, %c0_3] : memref<1x128xi32, #tpu.memory_space<vmem>>, vector<1x128xi32>
    %c0_4 = arith.constant 0 : index
    %c0_5 = arith.constant 0 : index
    %5 = vector.load %arg3[%c0_4, %c0_5] : memref<128x1xi32, #tpu.memory_space<vmem>>, vector<128x1xi32>
    %c0_6 = arith.constant 0 : index
    %c0_7 = arith.constant 0 : index
    %6 = vector.load %arg4[%c0_6, %c0_7] : memref<128x1xi32, #tpu.memory_space<vmem>>, vector<128x1xi32>
    %7 = tpu.iota {dimensions = array<i32: 1>} : vector<128x16xi32>
    %8 = vector.broadcast %3 : vector<128x1xi32> to vector<128x16xi32>
    %9 = arith.cmpi eq, %7, %8 : vector<128x16xi32>
    %10 = arith.extui %9 : vector<128x16xi1> to vector<128x16xi32>
    %11 = arith.sitofp %10 : vector<128x16xi32> to vector<128x16xf32>
    %12 = arith.truncf %11 : vector<128x16xf32> to vector<128x16xbf16>
    %13 = tpu.iota {dimensions = array<i32: 1>} : vector<128x8xi32>
    %14 = vector.broadcast %5 : vector<128x1xi32> to vector<128x8xi32>
    %15 = arith.cmpi eq, %13, %14 : vector<128x8xi32>
    %16 = arith.extui %15 : vector<128x8xi1> to vector<128x8xi32>
    %17 = arith.sitofp %16 : vector<128x8xi32> to vector<128x8xf32>
    %c0_8 = arith.constant 0 : index
    %c0_9 = arith.constant 0 : index
    %18 = vector.load %arg5[%c0_8, %c0_9] : memref<16x32xbf16, #tpu.memory_space<vmem>>, vector<16x32xbf16>
    %cst = arith.constant dense<0.000000e+00> : vector<128x32xf32>
    %19 = tpu.matmul %12, %18, %cst {dimension_numbers = #tpu.dot_dimension_numbers<[1], [0], [0], [1], [0, 0, 1, 1], [], []>} : vector<128x16xbf16>, vector<16x32xbf16>, vector<128x32xf32> -> vector<128x32xf32>
    %20 = tpu.concatenate %19, %17 in 1 : vector<128x32xf32>, vector<128x8xf32> -> vector<128x40xf32>
    %21 = arith.truncf %20 : vector<128x40xf32> to vector<128x40xbf16>
    %c0_10 = arith.constant 0 : index
    %c0_11 = arith.constant 0 : index
    %22 = vector.load %arg6[%c0_10, %c0_11] : memref<40x4xbf16, #tpu.memory_space<vmem>>, vector<40x4xbf16>
    %cst_12 = arith.constant dense<0.000000e+00> : vector<128x4xf32>
    %23 = tpu.matmul %21, %22, %cst_12 {dimension_numbers = #tpu.dot_dimension_numbers<[1], [0], [0], [1], [0, 0, 1, 1], [], []>} : vector<128x40xbf16>, vector<40x4xbf16>, vector<128x4xf32> -> vector<128x4xf32>
    %24 = arith.negf %23 : vector<128x4xf32>
    %25 = math.exp %24 : vector<128x4xf32>
    %cst_13 = arith.constant 1.000000e+00 : f32
    %26 = vector.broadcast %cst_13 : f32 to vector<128x4xf32>
    %27 = arith.addf %26, %25 : vector<128x4xf32>
    %28 = arith.divf %26, %27 : vector<128x4xf32>
    %29 = vector.extract_strided_slice %28 {offsets = [0, 0], sizes = [128, 1], strides = [1, 1]} : vector<128x4xf32> to vector<128x1xf32>
    %c0_i32_14 = arith.constant 0 : i32
    %30 = vector.broadcast %c0_i32_14 : i32 to vector<128x1xi32>
    %31 = arith.cmpi eq, %6, %30 : vector<128x1xi32>
    %32 = arith.extui %31 : vector<128x1xi1> to vector<128x1xi32>
    %33 = arith.sitofp %32 : vector<128x1xi32> to vector<128x1xf32>
    %34 = arith.mulf %29, %33 : vector<128x1xf32>
    %35 = vector.extract_strided_slice %28 {offsets = [0, 1], sizes = [128, 1], strides = [1, 1]} : vector<128x4xf32> to vector<128x1xf32>
    %c1_i32 = arith.constant 1 : i32
    %36 = vector.broadcast %c1_i32 : i32 to vector<128x1xi32>
    %37 = arith.cmpi eq, %6, %36 : vector<128x1xi32>
    %38 = arith.extui %37 : vector<128x1xi1> to vector<128x1xi32>
    %39 = arith.sitofp %38 : vector<128x1xi32> to vector<128x1xf32>
    %40 = arith.mulf %35, %39 : vector<128x1xf32>
    %41 = vector.extract_strided_slice %28 {offsets = [0, 2], sizes = [128, 1], strides = [1, 1]} : vector<128x4xf32> to vector<128x1xf32>
    %c2_i32 = arith.constant 2 : i32
    %42 = vector.broadcast %c2_i32 : i32 to vector<128x1xi32>
    %43 = arith.cmpi eq, %6, %42 : vector<128x1xi32>
    %44 = arith.extui %43 : vector<128x1xi1> to vector<128x1xi32>
    %45 = arith.sitofp %44 : vector<128x1xi32> to vector<128x1xf32>
    %46 = arith.mulf %41, %45 : vector<128x1xf32>
    %47 = vector.extract_strided_slice %28 {offsets = [0, 3], sizes = [128, 1], strides = [1, 1]} : vector<128x4xf32> to vector<128x1xf32>
    %c3_i32 = arith.constant 3 : i32
    %48 = vector.broadcast %c3_i32 : i32 to vector<128x1xi32>
    %49 = arith.cmpi eq, %6, %48 : vector<128x1xi32>
    %50 = arith.extui %49 : vector<128x1xi1> to vector<128x1xi32>
    %51 = arith.sitofp %50 : vector<128x1xi32> to vector<128x1xf32>
    %52 = arith.mulf %47, %51 : vector<128x1xf32>
    %53 = vector.broadcast %34 : vector<128x1xf32> to vector<128x32xf32>
    %54 = arith.mulf %53, %19 : vector<128x32xf32>
    %55 = vector.broadcast %40 : vector<128x1xf32> to vector<128x32xf32>
    %56 = arith.mulf %55, %19 : vector<128x32xf32>
    %57 = vector.broadcast %46 : vector<128x1xf32> to vector<128x32xf32>
    %58 = arith.mulf %57, %19 : vector<128x32xf32>
    %59 = vector.broadcast %52 : vector<128x1xf32> to vector<128x32xf32>
    %60 = arith.mulf %59, %19 : vector<128x32xf32>
    %61 = vector.broadcast %34 : vector<128x1xf32> to vector<128x8xf32>
    %62 = arith.mulf %61, %17 : vector<128x8xf32>
    %63 = vector.broadcast %40 : vector<128x1xf32> to vector<128x8xf32>
    %64 = arith.mulf %63, %17 : vector<128x8xf32>
    %65 = tpu.concatenate %54, %56, %58, %60, %62, %64 in 1 : vector<128x32xf32>, vector<128x32xf32>, vector<128x32xf32>, vector<128x32xf32>, vector<128x8xf32>, vector<128x8xf32> -> vector<128x144xf32>
    %66 = arith.truncf %65 : vector<128x144xf32> to vector<128x144xbf16>
    %c0_15 = arith.constant 0 : index
    %c0_16 = arith.constant 0 : index
    %67 = vector.load %arg7[%c0_15, %c0_16] : memref<144x32xbf16, #tpu.memory_space<vmem>>, vector<144x32xbf16>
    %cst_17 = arith.constant dense<0.000000e+00> : vector<128x32xf32>
    %68 = tpu.matmul %66, %67, %cst_17 {dimension_numbers = #tpu.dot_dimension_numbers<[1], [0], [0], [1], [0, 0, 1, 1], [], []>} : vector<128x144xbf16>, vector<144x32xbf16>, vector<128x32xf32> -> vector<128x32xf32>
    %69 = tpu.iota {dimensions = array<i32: 0>} : vector<16x128xi32>
    %70 = vector.broadcast %4 : vector<1x128xi32> to vector<16x128xi32>
    %71 = arith.cmpi eq, %69, %70 : vector<16x128xi32>
    %72 = arith.extui %71 : vector<16x128xi1> to vector<16x128xi32>
    %73 = arith.sitofp %72 : vector<16x128xi32> to vector<16x128xf32>
    %74 = arith.truncf %73 : vector<16x128xf32> to vector<16x128xbf16>
    %c0_18 = arith.constant 0 : index
    %c0_19 = arith.constant 0 : index
    %75 = vector.load %arg8[%c0_18, %c0_19] : memref<16x32xf32, #tpu.memory_space<vmem>>, vector<16x32xf32>
    %76 = arith.truncf %68 : vector<128x32xf32> to vector<128x32xbf16>
    %cst_20 = arith.constant dense<0.000000e+00> : vector<16x32xf32>
    %77 = tpu.matmul %74, %76, %cst_20 {dimension_numbers = #tpu.dot_dimension_numbers<[1], [0], [0], [1], [0, 0, 1, 1], [], []>} : vector<16x128xbf16>, vector<128x32xbf16>, vector<16x32xf32> -> vector<16x32xf32>
    %78 = arith.addf %75, %77 : vector<16x32xf32>
    %c0_21 = arith.constant 0 : index
    %c0_22 = arith.constant 0 : index
    %79 = vector.load %arg8[%c0_21, %c0_22] : memref<16x32xf32, #tpu.memory_space<vmem>>, vector<16x32xf32>
    tpu.vector_store %arg8[%c0_21, %c0_22], %78 {strides = array<i32>} : memref<16x32xf32, #tpu.memory_space<vmem>>, vector<16x32xf32>,
    return
  }
  func.func @transform_0(%arg0: i32) -> (i32, i32) {
    %c0_i32 = arith.constant 0 : i32
    %c0_i32_0 = arith.constant 0 : i32
    return %arg0, %c0_i32 : i32, i32
  }
  func.func @transform_1(%arg0: i32) -> (i32, i32) {
    %c0_i32 = arith.constant 0 : i32
    %c0_i32_0 = arith.constant 0 : i32
    return %c0_i32, %arg0 : i32, i32
  }
  func.func @transform_2(%arg0: i32) -> (i32, i32) {
    %c0_i32 = arith.constant 0 : i32
    %c0_i32_0 = arith.constant 0 : i32
    return %arg0, %c0_i32 : i32, i32
  }
  func.func @transform_3(%arg0: i32) -> (i32, i32) {
    %c0_i32 = arith.constant 0 : i32
    %c0_i32_0 = arith.constant 0 : i32
    return %arg0, %c0_i32 : i32, i32
  }
  func.func @transform_4(%arg0: i32) -> (i32, i32) {
    %c0_i32 = arith.constant 0 : i32
    %c0_i32_0 = arith.constant 0 : i32
    %c0_i32_1 = arith.constant 0 : i32
    return %c0_i32, %c0_i32_0 : i32, i32
  }
  func.func @transform_5(%arg0: i32) -> (i32, i32) {
    %c0_i32 = arith.constant 0 : i32
    %c0_i32_0 = arith.constant 0 : i32
    %c0_i32_1 = arith.constant 0 : i32
    return %c0_i32, %c0_i32_0 : i32, i32
  }
  func.func @transform_6(%arg0: i32) -> (i32, i32) {
    %c0_i32 = arith.constant 0 : i32
    %c0_i32_0 = arith.constant 0 : i32
    %c0_i32_1 = arith.constant 0 : i32
    return %c0_i32, %c0_i32_0 : i32, i32
  }
  func.func @transform_7(%arg0: i32) -> (i32, i32) {
    %c0_i32 = arith.constant 0 : i32
    %c0_i32_0 = arith.constant 0 : i32
    %c0_i32_1 = arith.constant 0 : i32
    return %c0_i32, %c0_i32_0 : i32, i32
  }
}

</mosaic_0001>

<bundles_post_ra>
// kernel: tpu_custom_call.1
= control target key start
LH: loop header
LB: loop body
LE: loop exit
PB: predicated region body
PF: predicated region fallthrough
CT: control target
= control target key end

     0   :  { %12 = vsyncpa [#allocation3], 0  ;;  %s3436_s24 = smov 0   ;;  %s4555_s0 = inlined_call_operand.vmem [shape: s32[256,1], index: 0, kind: input, shape index: {}]   ;;  %s4556_s1 = inlined_call_operand.vmem [shape: s32[1,256], index: 1, kind: input, shape index: {}]   ;;  %s4557_s2 = inlined_call_operand.vmem [shape: s32[256,1], index: 2, kind: input, shape index: {}]   ;;  %s4558_s3 = inlined_call_operand.vmem [shape: s32[256,1], index: 3, kind: input, shape index: {}]   ;;  %s4559_s4 = inlined_call_operand.vmem [shape: bf16[16,32], index: 4, kind: input, shape index: {}]   ;;  %s4560_s5 = inlined_call_operand.vmem [shape: bf16[40,4], index: 5, kind: input, shape index: {}]   ;;  %s4561_s6 = inlined_call_operand.vmem [shape: bf16[144,32], index: 6, kind: input, shape index: {}]   ;;  %s4562_s7 = inlined_call_operand.hbm [shape: f32[16,32], index: 7, kind: output, shape index: {}]  }
   0x1 LB: > { %s3442_s25 = sadd.s32 4294967295, %s3377_s24   ;;  %p2594_p0 = scmp.ge.s32.totalorder %s3377_s24, 1  ;;  %s3377_s24 = sphi %s3436_s24, %s18_s24  }
   0x2   : > { %p264_p1 = scmp.lt.s32.totalorder %s3377_s24, 3 }
   0x4   : > { %p265_p2 = pnand %p2594_p0, %p264_p1 }
   0x6   : > { %268 = sbr.rel (%p265_p2) target bundleno = 1461 (0x5b5), region = 48 }
   0xb   : > { %s2595_s26 = sshll.u32 %s3442_s25, 4  ;;  %p310_p3 = scmp.lt.s32.totalorder %s3442_s25, 1 }
   0xc   : > { %p305_p4 = scmp.lt.s32.totalorder %s2595_s26, 31  ;;  %p2601_p5 = scmp.ne.s32.totalorder %s3442_s25, 0 }
   0xd   : > { %s3449_s27 = scalar_select %p310_p3, %s3442_s25, 1 }
   0xe   : > { %s4665_s26 = smov (!%p305_p4, %s2595_s26), 31  ;;  %329 = sbr.rel (%p2601_p5) target bundleno = 21 (0x15), region = 52 }
   0xf   : > { %s312_s30 = scalar_lea.vmem %s4556_s1, %s3449_s27  ;;  %s2596_s8 = sshll.u32 %s4665_s26, 3 }
  0x10   : > { %s3458_s11 = scalar_lea.vmem %s4555_s0, %s2596_s8  ;;  %s3463_s14 = scalar_lea.vmem %s4557_s2, %s2596_s8 }
  0x11   : > { %s3468_s17 = scalar_lea.vmem %s4558_s3, %s2596_s8 }
  0x13   : > { %vm330_vm0 = vcmask 261120   ;;  %v3379_v0 = vmov 0.0  }
  0x14   : > { %331 = vst.msk [vmem:[#allocation2] sm:$0xff] %vm330_vm0, %v3379_v0  ;;  %332 = vst.msk [vmem:[#allocation2 + $0x8] sm:$0xff] %vm330_vm0, %v3379_v0 }
  0x15 PF: > { %v335_v1 = vld [vmem:[%s3458_s11 + $0x10] sm:$0xff]  ;;  %v333_v2 = vld [vmem:[%s3458_s11] sm:$0xff]  ;;  %v4568_v3 = vmov 0   ;;  %v336_v4 = vld [vmem:[%s3458_s11 + $0x18] sm:$0xff]  ;;  %v4563_v35 = vlaneseq  ;;  %vm592_vm5 = vcmask 130048   ;;  %v4570_v41 = vmov 0.0  }
  0x16   : > { %2882 = vset.pattern.permute.xlu1 %v4568_v3  ;;  %2881 = vset.pattern.permute.xlu0 %v4568_v3  ;;  %v334_v5 = vld [vmem:[%s3458_s11 + $0x8] sm:$0xff]  ;;  %v337_v7 = vld [vmem:[%s3458_s11 + $0x20] sm:$0xff]  ;;  %v340_v8 = vld [vmem:[%s3458_s11 + $0x38] sm:$0xff]  ;;  %s3382_s20 = smov 32   ;;  %s3383_s8 = smov 1  }
  0x17   : > { %391 = vperm.xlu1 %2882, %v335_v1   ;;  %385 = vperm.xlu0 %2881, %v333_v2   ;;  %v338_v6 = vld [vmem:[%s3458_s11 + $0x28] sm:$0xff]  ;;  %v339_v9 = vld [vmem:[%s3458_s11 + $0x30] sm:$0xff]  ;;  %v3261_v10 = vld [vmem:[%s4559_s4] sm:$0xff]   ;;  %v3510_v36 = vand.u32 127, %v4563_v35  ;;  %s3384_s9 = smov 2   ;;  %s3385_s10 = smov 3  }
  0x18   : > { %2344 = vmatprep.subr.bf16.mxu0 %v4568_v3  ;;  %v342_v11 = vld [vmem:[%s3458_s11 + $0x48] sm:$0xff]  ;;  %v341_v12 = vld [vmem:[%s3458_s11 + $0x40] sm:$0xff]  ;;  %2789 = vmatprep.subr.bf16.mxu1 %v3261_v10  ;;  %v344_v13 = vld [vmem:[%s3458_s11 + $0x58] sm:$0xff]  ;;  %s3390_s26 = smov 64   ;;  %s3394_s16 = smov [#allocation2]  }
  0x19   : > { %2790 = vmatpush3.bf16.msra.mxu1 %v3261_v10  ;;  %v343_v14 = vld [vmem:[%s3458_s11 + $0x50] sm:$0xff]  ;;  %v346_v15 = vld [vmem:[%s3458_s11 + $0x68] sm:$0xff]  ;;  %v345_v16 = vld [vmem:[%s3458_s11 + $0x60] sm:$0xff]  ;;  %s2516_s18 = sshll.u32 %s3394_s16, 4  ;;  %p2854_p6 = scmp.eq.s32.totalorder %s3442_s25, 1  ;;  %s2517_s18 = int_to_ptr.vmem [resolvable:$true] %s2516_s18 }
  0x1a   : > { %v348_v17 = vld [vmem:[%s3458_s11 + $0x78] sm:$0xff]  ;;  %v347_v18 = vld [vmem:[%s3458_s11 + $0x70] sm:$0xff]  ;;  %v351_v19 = vld [vmem:[%s3463_s14 + $0x8] sm:$0xff]  ;;  %s3389_s11 = smov 8   ;;  %s3343_s27 = scalar_lea.vmem %s2517_s18, 256 }
  0x1b   : > { %394 = vperm.xlu1 %2882, %v336_v4   ;;  %388 = vperm.xlu0 %2881, %v334_v5   ;;  %v350_v20 = vld [vmem:[%s3463_s14] sm:$0xff]  ;;  %v353_v21 = vld [vmem:[%s3463_s14 + $0x18] sm:$0xff]  ;;  %v352_v22 = vld [vmem:[%s3463_s14 + $0x10] sm:$0xff]  ;;  %p3344_p7 = scmp.ne.s32.totalorder %s2517_s18, %s3343_s27  ;;  %p3350_p10 = scmp.lt.s32.totalorder %s2517_s18, %s2517_s18 }
  0x1c   : > { %v355_v23 = vld [vmem:[%s3463_s14 + $0x28] sm:$0xff]  ;;  %v354_v24 = vld [vmem:[%s3463_s14 + $0x20] sm:$0xff]  ;;  %v357_v25 = vld [vmem:[%s3463_s14 + $0x38] sm:$0xff]  ;;  %p3351_p11 = scmp.lt.s32.totalorder %s3343_s27, %s3343_s27 }
  0x1d   : > { %v356_v26 = vld [vmem:[%s3463_s14 + $0x30] sm:$0xff]  ;;  %v359_v27 = vld [vmem:[%s3463_s14 + $0x48] sm:$0xff]  ;;  %v358_v28 = vld [vmem:[%s3463_s14 + $0x40] sm:$0xff]  ;;  %p3345_p8 = pnand %p3344_p7, %p2854_p6 }
  0x1e   : > { %v361_v29 = vld [vmem:[%s3463_s14 + $0x58] sm:$0xff]  ;;  %v360_v30 = vld [vmem:[%s3463_s14 + $0x50] sm:$0xff]  ;;  %v363_v31 = vld [vmem:[%s3463_s14 + $0x68] sm:$0xff]  ;;  %p3352_p12 = por %p3351_p11, %p3350_p10 }
  0x1f   : > { %400 = vperm.xlu1 %2882, %v338_v6   ;;  %397 = vperm.xlu0 %2881, %v337_v7   ;;  %v362_v32 = vld [vmem:[%s3463_s14 + $0x60] sm:$0xff]  ;;  %v365_v33 = vld [vmem:[%s3463_s14 + $0x78] sm:$0xff]  ;;  %v364_v34 = vld [vmem:[%s3463_s14 + $0x70] sm:$0xff]  ;;  %p3346_p9 = pneg %p3345_p8 }
  0x21   : > { %p3353_p13 = pnand %p3352_p12, %p3346_p9 }
  0x23   : > { %406 = vperm.xlu1 %2882, %v340_v8   ;;  %403 = vperm.xlu0 %2881, %v339_v9  }
  0x27   : > { %412 = vperm.xlu1 %2882, %v342_v11   ;;  %409 = vperm.xlu0 %2881, %v341_v12  }
  0x2b   : > { %418 = vperm.xlu1 %2882, %v344_v13   ;;  %415 = vperm.xlu0 %2881, %v343_v14  }
  0x2f   : > { %424 = vperm.xlu1 %2882, %v346_v15   ;;  %421 = vperm.xlu0 %2881, %v345_v16  }
  0x33   : > { %430 = vperm.xlu1 %2882, %v348_v17   ;;  %427 = vperm.xlu0 %2881, %v347_v18  }
  0x37   : > { %492 = vperm.xlu1 %2882, %v351_v19   ;;  %489 = vperm.xlu0 %2881, %v350_v20  }
  0x3b   : > { %498 = vperm.xlu1 %2882, %v353_v21   ;;  %495 = vperm.xlu0 %2881, %v352_v22  }
  0x3f   : > { %504 = vperm.xlu1 %2882, %v355_v23   ;;  %501 = vperm.xlu0 %2881, %v354_v24  }
  0x43   : > { %510 = vperm.xlu1 %2882, %v357_v25   ;;  %507 = vperm.xlu0 %2881, %v356_v26  }
  0x47   : > { %516 = vperm.xlu1 %2882, %v359_v27   ;;  %513 = vperm.xlu0 %2881, %v358_v28  }
  0x4b   : > { %522 = vperm.xlu1 %2882, %v361_v29   ;;  %519 = vperm.xlu0 %2881, %v360_v30  }
  0x4f   : > { %528 = vperm.xlu1 %2882, %v363_v31   ;;  %525 = vperm.xlu0 %2881, %v362_v32  }
  0x53   : > { %534 = vperm.xlu1 %2882, %v365_v33   ;;  %531 = vperm.xlu0 %2881, %v364_v34  }
  0x92   : > { %v392_v37 = vpop.permute.xlu1 %391  ;;  %v386_v38 = vpop.permute.xlu0 %385 }
  0x93   : > { %vm434_vm1 = vcmp.eq.s32.totalorder %v3510_v36, %v392_v37  ;;  %vm432_vm2 = vcmp.eq.s32.totalorder %v3510_v36, %v386_v38 }
  0x94   : > { %v2604_v42 = vsel %vm434_vm1, 1.0, %v4570_v41  ;;  %v2602_v44 = vsel %vm432_vm2, 1.0, %v4570_v41 }
  0x96   : > { %v395_v39 = vpop.permute.xlu1 %394  ;;  %v389_v40 = vpop.permute.xlu0 %388 }
  0x97   : > { %vm435_vm3 = vcmp.eq.s32.totalorder %v3510_v36, %v395_v39  ;;  %vm433_vm4 = vcmp.eq.s32.totalorder %v3510_v36, %v389_v40 }
  0x98   : > { %v2605_v43 = vsel %vm435_vm3, 1.0, %v4570_v41  ;;  %v2603_v45 = vsel %vm433_vm4, 1.0, %v4570_v41 }
  0x99   : > { %v481_v46 = vpack.c.bf16 %v2605_v43, %v2604_v42  ;;  %v480_v47 = vpack.c.bf16 %v2603_v45, %v2602_v44  ;;  %v3262_v45 = vld [vmem:[%s4560_s5 + $0x10] ss:$0 sps:$4 sm:$0xff]  }
  0x9a   : > { %v401_v48 = vpop.permute.xlu1 %400  ;;  %v398_v49 = vpop.permute.xlu0 %397 }
  0x9b   : > { %vm437_vm6 = vcmp.eq.s32.totalorder %v3510_v36, %v401_v48  ;;  %vm436_vm7 = vcmp.eq.s32.totalorder %v3510_v36, %v398_v49  ;;  %2791 = vmatprep.mubr.msk.bf16.mxu1 %vm592_vm5, %v480_v47 }
  0x9c   : > { %v2607_v50 = vsel %vm437_vm6, 1.0, %v4570_v41  ;;  %v2606_v51 = vsel %vm436_vm7, 1.0, %v4570_v41  ;;  %2792 = vmatmul.mubr.msk.bf16.vlgmr.msra.gmra.mxu1 %vm592_vm5, %v481_v46  ;;  %v3263_v46 = vld [vmem:[%s4560_s5 + $0x8] sm:$0xff]  }
  0x9d   : > { %v482_v52 = vpack.c.bf16 %v2607_v50, %v2606_v51 }
  0x9e   : > { %v407_v53 = vpop.permute.xlu1 %406  ;;  %v404_v54 = vpop.permute.xlu0 %403 }
  0x9f   : > { %vm439_vm8 = vcmp.eq.s32.totalorder %v3510_v36, %v407_v53  ;;  %vm438_vm9 = vcmp.eq.s32.totalorder %v3510_v36, %v404_v54  ;;  %2795 = vmatprep.mubr.msk.bf16.mxu1 %vm592_vm5, %v482_v52 }
  0xa0   : > { %v2609_v55 = vsel %vm439_vm8, 1.0, %v4570_v41  ;;  %v2608_v56 = vsel %vm438_vm9, 1.0, %v4570_v41 }
  0xa1   : > { %v483_v57 = vpack.c.bf16 %v2609_v55, %v2608_v56 }
  0xa2   : > { %v413_v58 = vpop.permute.xlu1 %412  ;;  %v410_v59 = vpop.permute.xlu0 %409 }
  0xa3   : > { %vm441_vm10 = vcmp.eq.s32.totalorder %v3510_v36, %v413_v58  ;;  %vm440_vm11 = vcmp.eq.s32.totalorder %v3510_v36, %v410_v59 }
  0xa4   : > { %v2611_v60 = vsel %vm441_vm10, 1.0, %v4570_v41  ;;  %v2610_v61 = vsel %vm440_vm11, 1.0, %v4570_v41  ;;  %2796 = vmatmul.mubr.msk.bf16.gmra.mxu1 %vm592_vm5, %v483_v57 }
  0xa5   : > { %v484_v62 = vpack.c.bf16 %v2611_v60, %v2610_v61  ;;  %v3264_v61 = vld [vmem:[%s4560_s5] sm:$0xff]  }
  0xa6   : > { %v419_v63 = vpop.permute.xlu1 %418  ;;  %v416_v0 = vpop.permute.xlu0 %415 }
  0xa7   : > { %vm443_vm12 = vcmp.eq.s32.totalorder %v3510_v36, %v419_v63  ;;  %vm442_vm13 = vcmp.eq.s32.totalorder %v3510_v36, %v416_v0  ;;  %2799 = vmatprep.mubr.msk.bf16.mxu1 %vm592_vm5, %v484_v62  ;;  %v3654_v62 = vld [vmem:[%s3468_s17 + $0x8] sm:$0xff]  ;;  %v3661_v63 = vld [vmem:[%s3468_s17 + $0x10] sm:$0xff]  ;;  %v3664_v0 = vld [vmem:[%s3468_s17 + $0x18] sm:$0xff] }
  0xa8   : > { %v2613_v1 = vsel %vm443_vm12, 1.0, %v4570_v41  ;;  %v2612_v2 = vsel %vm442_vm13, 1.0, %v4570_v41  ;;  %vm848_vm13 = vcmask 1043456  }
  0xa9   : > { %v485_v4 = vpack.c.bf16 %v2613_v1, %v2612_v2  ;;  %2849 = vmatprep.subr.msk.bf16.mxu1 %vm848_vm13, %v3262_v45  ;;  %v850_v49 = vsel %vm848_vm13, %v3262_v45, 0  ;;  %vm1239_vm13 = vcmp.eq.s32.totalorder %v3661_v63, 2 }
  0xaa   : > { %v425_v5 = vpop.permute.xlu1 %424  ;;  %v422_v6 = vpop.permute.xlu0 %421  ;;  %2808 = vmatpush3.bf16.msra.mxu1 %v850_v49  ;;  %v374_v49 = vld [vmem:[%s3468_s17 + $0x40] sm:$0xff] }
  0xab   : > { %vm445_vm14 = vcmp.eq.s32.totalorder %v3510_v36, %v425_v5  ;;  %vm444_vm15 = vcmp.eq.s32.totalorder %v3510_v36, %v422_v6  ;;  %2809 = vmatprep.subr.bf16.mxu1 %v3263_v46 }
  0xac   : > { %v2615_v7 = vsel %vm445_vm14, 1.0, %v4570_v41  ;;  %v2614_v8 = vsel %vm444_vm15, 1.0, %v4570_v41  ;;  %2800 = vmatmul.mubr.msk.bf16.gmra.mxu1 %vm592_vm5, %v485_v4 }
  0xad   : > { %v486_v9 = vpack.c.bf16 %v2615_v7, %v2614_v8 }
  0xae   : > { %v431_v10 = vpop.permute.xlu1 %430  ;;  %v428_v11 = vpop.permute.xlu0 %427  ;;  %2810 = vmatpush3.bf16.msra.mxu1 %v3263_v46 }
  0xaf   : > { %vm447_vm0 = vcmp.eq.s32.totalorder %v3510_v36, %v431_v10  ;;  %vm446_vm1 = vcmp.eq.s32.totalorder %v3510_v36, %v428_v11  ;;  %2803 = vmatprep.mubr.msk.bf16.mxu1 %vm592_vm5, %v486_v9  ;;  %2811 = vmatprep.subr.bf16.mxu1 %v3264_v61  ;;  %v3677_v10 = vld [vmem:[%s3468_s17 + $0x20] sm:$0xff] }
  0xb0   : > { %v2617_v12 = vsel %vm447_vm0, 1.0, %v4570_v41  ;;  %v2616_v13 = vsel %vm446_vm1, 1.0, %v4570_v41 }
  0xb1   : > { %v487_v14 = vpack.c.bf16 %v2617_v12, %v2616_v13 }
  0xb2   : > { %v493_v15 = vpop.permute.xlu1 %492  ;;  %v490_v16 = vpop.permute.xlu0 %489  ;;  %2812 = vmatpush3.bf16.msra.mxu1 %v3264_v61  ;;  %v3737_v61 = vld [vmem:[%s3468_s17 + $0x50] sm:$0xff] }
  0xb3   : > { %vm537_vm2 = vcmp.eq.s32.totalorder %v3510_v36, %v493_v15  ;;  %vm536_vm3 = vcmp.eq.s32.totalorder %v3510_v36, %v490_v16  ;;  %2829 = vmatprep.subr.bf16.mxu1 %v4570_v41  ;;  %v2704_v16 = vsel %vm1239_vm13, 1.0, %v4570_v41 }
  0xb4   : > { %v3554_v17 = vsel %vm537_vm2, 1.0, %v4570_v41  ;;  %v3557_v18 = vsel %vm536_vm3, 1.0, %v4570_v41  ;;  %2804 = vmatmul.mubr.msk.bf16.gmra.mxu1 %vm592_vm5, %v487_v14  ;;  %v3685_v14 = vld [vmem:[%s3468_s17 + $0x28] sm:$0xff] }
  0xb5   : > { %v2883_v19 = vpack.i.bf16 %v3554_v17, %v3557_v18 }
  0xb6   : > { %v499_v20 = vpop.permute.xlu1 %498  ;;  %v496_v21 = vpop.permute.xlu0 %495 }
  0xb7   : > { %vm539_vm4 = vcmp.eq.s32.totalorder %v3510_v36, %v499_v20  ;;  %vm538_vm6 = vcmp.eq.s32.totalorder %v3510_v36, %v496_v21  ;;  %2884 = vrot.lane.b32.xlu0 %v2883_v19, %s3382_s20 }
  0xb8   : > { %v3566_v22 = vsel %vm539_vm4, 1.0, %v4570_v41  ;;  %v3569_v23 = vsel %vm538_vm6, 1.0, %v4570_v41  ;;  %vm1110_vm6 = vcmp.eq.s32.totalorder %v3654_v62, 1 }
  0xb9   : > { %v2888_v24 = vpack.i.bf16 %v3566_v22, %v3569_v23  ;;  %v2687_v2 = vsel %vm1110_vm6, 1.0, %v4570_v41  ;;  %vm1369_vm6 = vcmp.eq.s32.totalorder %v3677_v10, 3 }
  0xba   : > { %v505_v25 = vpop.permute.xlu1 %504  ;;  %v502_v26 = vpop.permute.xlu0 %501 }
  0xbb   : > { %vm541_vm7 = vcmp.eq.s32.totalorder %v3510_v36, %v505_v25  ;;  %vm540_vm8 = vcmp.eq.s32.totalorder %v3510_v36, %v502_v26  ;;  %2889 = vrot.lane.b32.xlu1 %v2888_v24, %s3382_s20  ;;  %v3697_v24 = vld [vmem:[%s3468_s17 + $0x30] sm:$0xff] }
  0xbc   : > { %v3577_v27 = vsel %vm541_vm7, 1.0, %v4570_v41  ;;  %v3580_v28 = vsel %vm540_vm8, 1.0, %v4570_v41  ;;  %vm1238_vm8 = vcmp.eq.s32.totalorder %v3654_v62, 2 }
  0xbd   : > { %4616 = vst [vmem:[#allocation5_spill] sm:$0xff] %v3577_v27  ;;  %4617 = vst [vmem:[#allocation6_spill] sm:$0xff] %v3580_v28  ;;  %v2893_v29 = vpack.i.bf16 %v3577_v27, %v3580_v28  ;;  %v2703_v5 = vsel %vm1238_vm8, 1.0, %v4570_v41  ;;  %vm1115_vm8 = vcmp.eq.s32.totalorder %v3697_v24, 1 }
  0xbe   : > { %v511_v30 = vpop.permute.xlu1 %510  ;;  %v508_v31 = vpop.permute.xlu0 %507  ;;  %v2692_v45 = vsel %vm1115_vm8, 1.0, %v4570_v41 }
  0xbf   : > { %vm543_vm9 = vcmp.eq.s32.totalorder %v3510_v36, %v511_v30  ;;  %vm542_vm10 = vcmp.eq.s32.totalorder %v3510_v36, %v508_v31  ;;  %2894 = vrot.lane.b32.xlu0 %v2893_v29, %s3382_s20  ;;  %v3704_v29 = vld [vmem:[%s3468_s17 + $0x38] sm:$0xff] }
  0xc0   : > { %v3588_v32 = vsel %vm543_vm9, 1.0, %v4570_v41  ;;  %v3591_v33 = vsel %vm542_vm10, 1.0, %v4570_v41  ;;  %vm1366_vm10 = vcmp.eq.s32.totalorder %v3654_v62, 3  ;;  %vm1372_vm13 = vcmp.eq.s32.totalorder %v3704_v29, 3 }
  0xc1   : > { %4618 = vst [vmem:[#allocation7_spill] sm:$0xff] %v3591_v33  ;;  %v2898_v34 = vpack.i.bf16 %v3588_v32, %v3591_v33  ;;  %v2719_v9 = vsel %vm1366_vm10, 1.0, %v4570_v41  ;;  %vm1243_vm10 = vcmp.eq.s32.totalorder %v3697_v24, 2 }
  0xc2   : > { %v517_v37 = vpop.permute.xlu1 %516  ;;  %v514_v38 = vpop.permute.xlu0 %513 }
  0xc3   : > { %vm545_vm11 = vcmp.eq.s32.totalorder %v3510_v36, %v517_v37  ;;  %vm544_vm12 = vcmp.eq.s32.totalorder %v3510_v36, %v514_v38  ;;  %2899 = vrot.lane.b32.xlu1 %v2898_v34, %s3382_s20 }
  0xc4   : > { %v3599_v39 = vsel %vm545_vm11, 1.0, %v4570_v41  ;;  %v3602_v40 = vsel %vm544_vm12, 1.0, %v4570_v41  ;;  %vm1111_vm11 = vcmp.eq.s32.totalorder %v3661_v63, 1  ;;  %vm1112_vm12 = vcmp.eq.s32.totalorder %v3664_v0, 1 }
  0xc5   : > { %4619 = vst [vmem:[#allocation8_spill] sm:$0xff] %v3599_v39  ;;  %4620 = vst [vmem:[#allocation9_spill] sm:$0xff] %v3602_v40  ;;  %v2903_v42 = vpack.i.bf16 %v3599_v39, %v3602_v40  ;;  %v2688_v12 = vsel %vm1111_vm11, 1.0, %v4570_v41  ;;  %v2689_v13 = vsel %vm1112_vm12, 1.0, %v4570_v41  ;;  %vm1244_vm11 = vcmp.eq.s32.totalorder %v3704_v29, 2 }
  0xc6   : > { %v523_v43 = vpop.permute.xlu1 %522  ;;  %v520_v44 = vpop.permute.xlu0 %519  ;;  %v2938_v15 = vpack.i.bf16 %v2689_v13, %v2688_v12  ;;  %vm1371_vm12 = vcmp.eq.s32.totalorder %v3697_v24, 3 }
  0xc7   : > { %vm547_vm14 = vcmp.eq.s32.totalorder %v3510_v36, %v523_v43  ;;  %vm546_vm15 = vcmp.eq.s32.totalorder %v3510_v36, %v520_v44  ;;  %2904 = vrot.lane.b32.xlu0 %v2903_v42, %s3382_s20  ;;  %v2722_v43 = vsel %vm1369_vm6, 1.0, %v4570_v41 }
  0xc8   : > { %v3616_v47 = vsel %vm547_vm14, 1.0, %v4570_v41  ;;  %v3619_v48 = vsel %vm546_vm15, 1.0, %v4570_v41  ;;  %vm1240_vm14 = vcmp.eq.s32.totalorder %v3664_v0, 2  ;;  %vm1367_vm15 = vcmp.eq.s32.totalorder %v3661_v63, 3 }
  0xc9   : > { %4621 = vst [vmem:[#allocation10_spill] sm:$0xff] %v3616_v47  ;;  %4622 = vst [vmem:[#allocation11_spill] sm:$0xff] %v3619_v48  ;;  %v2908_v50 = vpack.i.bf16 %v3616_v47, %v3619_v48  ;;  %v2705_v19 = vsel %vm1240_vm14, 1.0, %v4570_v41  ;;  %v2720_v20 = vsel %vm1367_vm15, 1.0, %v4570_v41  ;;  %vm1117_vm14 = vcmp.eq.s32.totalorder %v374_v49, 1 }
  0xca   : > { %v529_v51 = vpop.permute.xlu1 %528  ;;  %v526_v52 = vpop.permute.xlu0 %525  ;;  %v2943_v25 = vpack.i.bf16 %v2705_v19, %v2704_v16  ;;  %v378_v19 = vld [vmem:[%s3468_s17 + $0x60] sm:$0xff]  ;;  %v4638_v48 = vmov 0  }
  0xcb   : > { %vm549_vm0 = vcmp.eq.s32.totalorder %v3510_v36, %v529_v51  ;;  %vm548_vm1 = vcmp.eq.s32.totalorder %v3510_v36, %v526_v52  ;;  %2909 = vrot.lane.b32.xlu1 %v2908_v50, %s3382_s20  ;;  %v3726_v50 = vld [vmem:[%s3468_s17 + $0x48] sm:$0xff] }
  0xcc   : > { %v3627_v53 = vsel %vm549_vm0, 1.0, %v4570_v41  ;;  %v3630_v54 = vsel %vm548_vm1, 1.0, %v4570_v41  ;;  %vm1368_vm0 = vcmp.eq.s32.totalorder %v3664_v0, 3  ;;  %vm1113_vm1 = vcmp.eq.s32.totalorder %v3677_v10, 1 }
  0xcd   : > { %4623 = vst [vmem:[#allocation12_spill] sm:$0xff] %v3627_v53  ;;  %4624 = vst [vmem:[#allocation13_spill] sm:$0xff] %v3630_v54  ;;  %v2913_v55 = vpack.i.bf16 %v3627_v53, %v3630_v54  ;;  %v2721_v21 = vsel %vm1368_vm0, 1.0, %v4570_v41  ;;  %v2690_v30 = vsel %vm1113_vm1, 1.0, %v4570_v41  ;;  %vm1118_vm15 = vcmp.eq.s32.totalorder %v3726_v50, 1 }
  0xce   : > { %v535_v56 = vpop.permute.xlu1 %534  ;;  %v532_v57 = vpop.permute.xlu0 %531  ;;  %v2948_v26 = vpack.i.bf16 %v2721_v21, %v2720_v20  ;;  %vm1245_vm0 = vcmp.eq.s32.totalorder %v374_v49, 2  ;;  %vm1246_vm1 = vcmp.eq.s32.totalorder %v3726_v50, 2  ;;  %v379_v20 = vld [vmem:[%s3468_s17 + $0x68] sm:$0xff] }
  0xcf   : > { %vm551_vm2 = vcmp.eq.s32.totalorder %v3510_v36, %v535_v56  ;;  %vm550_vm3 = vcmp.eq.s32.totalorder %v3510_v36, %v532_v57  ;;  %2914 = vrot.lane.b32.xlu0 %v2913_v55, %s3382_s20  ;;  %v3651_v36 = vld [vmem:[%s3468_s17] sm:$0xff]  ;;  %v2708_v55 = vsel %vm1243_vm10, 1.0, %v4570_v41  ;;  %v2709_v56 = vsel %vm1244_vm11, 1.0, %v4570_v41 }
  0xd0   : > { %v3638_v58 = vsel %vm551_vm2, 1.0, %v4570_v41  ;;  %v3641_v59 = vsel %vm550_vm3, 1.0, %v4570_v41  ;;  %vm1109_vm4 = vcmp.eq.s32.totalorder %v3651_v36, 1  ;;  %vm1237_vm7 = vcmp.eq.s32.totalorder %v3651_v36, 2 }
  0xd1   : > { %4625 = vst [vmem:[#allocation14_spill] sm:$0xff] %v3638_v58  ;;  %4626 = vst [vmem:[#allocation15_spill] sm:$0xff] %v3641_v59  ;;  %v2918_v60 = vpack.i.bf16 %v3638_v58, %v3641_v59  ;;  %v2686_v1 = vsel %vm1109_vm4, 1.0, %v4570_v41  ;;  %v2702_v4 = vsel %vm1237_vm7, 1.0, %v4570_v41  ;;  %vm1365_vm9 = vcmp.eq.s32.totalorder %v3651_v36, 3 }
  0xd2   : > { %v2923_v6 = vpack.i.bf16 %v2687_v2, %v2686_v1  ;;  %v2928_v7 = vpack.i.bf16 %v2703_v5, %v2702_v4  ;;  %v2718_v8 = vsel %vm1365_vm9, 1.0, %v4570_v41  ;;  %vm1114_vm2 = vcmp.eq.s32.totalorder %v3685_v14, 1  ;;  %v3740_v1 = vld [vmem:[%s3468_s17 + $0x58] sm:$0xff] }
  0xd3   : > { %2919 = vrot.lane.b32.xlu1 %v2918_v60, %s3382_s20  ;;  %v2933_v11 = vpack.i.bf16 %v2719_v9, %v2718_v8  ;;  %vm1241_vm3 = vcmp.eq.s32.totalorder %v3677_v10, 2  ;;  %vm1242_vm4 = vcmp.eq.s32.totalorder %v3685_v14, 2  ;;  %v2691_v31 = vsel %vm1114_vm2, 1.0, %v4570_v41 }
  0xd4   : > { %2924 = vrot.lane.b32.xlu0 %v2923_v6, %s3383_s8  ;;  %v2706_v34 = vsel %vm1241_vm3, 1.0, %v4570_v41  ;;  %v2707_v37 = vsel %vm1242_vm4, 1.0, %v4570_v41  ;;  %vm1370_vm7 = vcmp.eq.s32.totalorder %v3685_v14, 3  ;;  %vm1116_vm9 = vcmp.eq.s32.totalorder %v3704_v29, 1 }
  0xd5   : > { %v2953_v38 = vpack.i.bf16 %v2691_v31, %v2690_v30  ;;  %v2958_v42 = vpack.i.bf16 %v2707_v37, %v2706_v34  ;;  %v2723_v44 = vsel %vm1370_vm7, 1.0, %v4570_v41  ;;  %v2693_v46 = vsel %vm1116_vm9, 1.0, %v4570_v41  ;;  %v380_v37 = vld [vmem:[%s3468_s17 + $0x70] sm:$0xff] }
  0xd6   : > { %v2963_v51 = vpack.i.bf16 %v2723_v44, %v2722_v43  ;;  %v2968_v52 = vpack.i.bf16 %v2693_v46, %v2692_v45  ;;  %v2724_v57 = vsel %vm1371_vm12, 1.0, %v4570_v41  ;;  %v2725_v60 = vsel %vm1372_vm13, 1.0, %v4570_v41 }
  0xd7   : > { %2929 = vrot.lane.b32.xlu1 %v2928_v7, %s3384_s9  ;;  %v2973_v2 = vpack.i.bf16 %v2709_v56, %v2708_v55  ;;  %v2978_v4 = vpack.i.bf16 %v2725_v60, %v2724_v57  ;;  %v2694_v5 = vsel %vm1117_vm14, 1.0, %v4570_v41  ;;  %v2695_v6 = vsel %vm1118_vm15, 1.0, %v4570_v41 }
  0xd8   : > { %2934 = vrot.lane.b32.xlu0 %v2933_v11, %s3385_s10  ;;  %v2710_v7 = vsel %vm1245_vm0, 1.0, %v4570_v41  ;;  %v2711_v8 = vsel %vm1246_vm1, 1.0, %v4570_v41  ;;  %vm1373_vm2 = vcmp.eq.s32.totalorder %v374_v49, 3  ;;  %vm1374_vm3 = vcmp.eq.s32.totalorder %v3726_v50, 3 }
  0xd9   : > { %vm1119_vm4 = vcmp.eq.s32.totalorder %v3737_v61, 1  ;;  %vm1120_vm6 = vcmp.eq.s32.totalorder %v3740_v1, 1  ;;  %v2983_v9 = vpack.i.bf16 %v2695_v6, %v2694_v5  ;;  %v2988_v11 = vpack.i.bf16 %v2711_v8, %v2710_v7 }
  0xda   : > { %v2726_v12 = vsel %vm1373_vm2, 1.0, %v4570_v41  ;;  %v2727_v13 = vsel %vm1374_vm3, 1.0, %v4570_v41  ;;  %v2697_v16 = vsel %vm1120_vm6, 1.0, %v4570_v41  ;;  %vm1247_vm7 = vcmp.eq.s32.totalorder %v3737_v61, 2 }
  0xdb   : > { %2939 = vrot.lane.b32.xlu1 %v2938_v15, %s3383_s8  ;;  %v2696_v15 = vsel %vm1119_vm4, 1.0, %v4570_v41  ;;  %vm1248_vm8 = vcmp.eq.s32.totalorder %v3740_v1, 2  ;;  %vm1375_vm9 = vcmp.eq.s32.totalorder %v3737_v61, 3  ;;  %vm1376_vm10 = vcmp.eq.s32.totalorder %v3740_v1, 3 }
  0xdc   : > { %2944 = vrot.lane.b32.xlu0 %v2943_v25, %s3384_s9  ;;  %v2993_v21 = vpack.i.bf16 %v2727_v13, %v2726_v12  ;;  %v2998_v25 = vpack.i.bf16 %v2697_v16, %v2696_v15  ;;  %v2713_v30 = vsel %vm1248_vm8, 1.0, %v4570_v41  ;;  %v2728_v31 = vsel %vm1375_vm9, 1.0, %v4570_v41 }
  0xdd   : > { %v2729_v34 = vsel %vm1376_vm10, 1.0, %v4570_v41  ;;  %vm1121_vm11 = vcmp.eq.s32.totalorder %v378_v19, 1  ;;  %vm1122_vm12 = vcmp.eq.s32.totalorder %v379_v20, 1  ;;  %vm1249_vm13 = vcmp.eq.s32.totalorder %v378_v19, 2 }
  0xde   : > { %vm1250_vm14 = vcmp.eq.s32.totalorder %v379_v20, 2  ;;  %v3008_v43 = vpack.i.bf16 %v2729_v34, %v2728_v31  ;;  %v2698_v44 = vsel %vm1121_vm11, 1.0, %v4570_v41  ;;  %v2699_v45 = vsel %vm1122_vm12, 1.0, %v4570_v41 }
  0xdf   : > { %2949 = vrot.lane.b32.xlu1 %v2948_v26, %s3385_s10  ;;  %v2712_v26 = vsel %vm1247_vm7, 1.0, %v4570_v41  ;;  %v2714_v46 = vsel %vm1249_vm13, 1.0, %v4570_v41  ;;  %v2715_v49 = vsel %vm1250_vm14, 1.0, %v4570_v41  ;;  %vm1377_vm15 = vcmp.eq.s32.totalorder %v378_v19, 3 }
  0xe0   : > { %2954 = vrot.lane.b32.xlu0 %v2953_v38, %s3383_s8  ;;  %v381_v38 = vld [vmem:[%s3468_s17 + $0x78] sm:$0xff]  ;;  %vm1378_vm0 = vcmp.eq.s32.totalorder %v379_v20, 3  ;;  %vm1123_vm1 = vcmp.eq.s32.totalorder %v380_v37, 1  ;;  %v2730_v55 = vsel %vm1377_vm15, 1.0, %v4570_v41  ;;  %vm1251_vm3 = vcmp.eq.s32.totalorder %v380_v37, 2 }
  0xe1   : > { %vm1124_vm2 = vcmp.eq.s32.totalorder %v381_v38, 1  ;;  %v2731_v56 = vsel %vm1378_vm0, 1.0, %v4570_v41  ;;  %v2700_v57 = vsel %vm1123_vm1, 1.0, %v4570_v41  ;;  %vm1252_vm4 = vcmp.eq.s32.totalorder %v381_v38, 2 }
  0xe2   : > { %v2701_v60 = vsel %vm1124_vm2, 1.0, %v4570_v41  ;;  %vm1379_vm6 = vcmp.eq.s32.totalorder %v380_v37, 3  ;;  %vm1380_vm7 = vcmp.eq.s32.totalorder %v381_v38, 3  ;;  %v2716_v5 = vsel %vm1251_vm3, 1.0, %v4570_v41 }
  0xe3   : > { %2959 = vrot.lane.b32.xlu1 %v2958_v42, %s3384_s9  ;;  %v3003_v42 = vpack.i.bf16 %v2713_v30, %v2712_v26  ;;  %v2717_v6 = vsel %vm1252_vm4, 1.0, %v4570_v41  ;;  %v2732_v7 = vsel %vm1379_vm6, 1.0, %v4570_v41  ;;  %v2733_v8 = vsel %vm1380_vm7, 1.0, %v4570_v41 }
  0xe4   : > { %2964 = vrot.lane.b32.xlu0 %v2963_v51, %s3385_s10  ;;  %v3013_v51 = vpack.i.bf16 %v2699_v45, %v2698_v44  ;;  %vm778_vm8 = vcmask 261120   ;;  %vm823_vm9 = vcmask 326656   ;;  %vm1047_vm10 = vcmp.eq.s32.totalorder %v3661_v63, 0 }
  0xe5   : > { %vm1045_vm11 = vcmp.eq.s32.totalorder %v3651_v36, 0  ;;  %vm1048_vm12 = vcmp.eq.s32.totalorder %v3664_v0, 0  ;;  %vm1052_vm13 = vcmp.eq.s32.totalorder %v3704_v29, 0  ;;  %vm1050_vm14 = vcmp.eq.s32.totalorder %v3685_v14, 0 }
  0xe6   : > { %vm1046_vm15 = vcmp.eq.s32.totalorder %v3654_v62, 0  ;;  %vm1051_vm0 = vcmp.eq.s32.totalorder %v3697_v24, 0  ;;  %vm1056_vm1 = vcmp.eq.s32.totalorder %v3740_v1, 0  ;;  %vm1054_vm2 = vcmp.eq.s32.totalorder %v3726_v50, 0 }
  0xe7   : > { %2969 = vrot.lane.b32.xlu1 %v2968_v52, %s3383_s8  ;;  %v3018_v52 = vpack.i.bf16 %v2715_v49, %v2714_v46  ;;  %vm1049_vm3 = vcmp.eq.s32.totalorder %v3677_v10, 0  ;;  %vm1055_vm4 = vcmp.eq.s32.totalorder %v3737_v61, 0  ;;  %v3338_v61 = vld [vmem:[%s3468_s17 + $0x40] sm:$0xff] }
  0xe8   : > { %2974 = vrot.lane.b32.xlu0 %v2973_v2, %s3384_s9  ;;  %v3023_v2 = vpack.i.bf16 %v2731_v56, %v2730_v55  ;;  %vm1053_vm6 = vcmp.eq.s32.totalorder %v3338_v61, 0  ;;  %v3267_v61 = vld [vmem:[%s4561_s6 + $0x28] sm:$0xff]  }
  0xeb   : > { %2979 = vrot.lane.b32.xlu1 %v2978_v4, %s3385_s10  ;;  %v3028_v4 = vpack.i.bf16 %v2701_v60, %v2700_v57 }
  0xec   : > { %2984 = vrot.lane.b32.xlu0 %v2983_v9, %s3383_s8  ;;  %v3033_v9 = vpack.i.bf16 %v2717_v6, %v2716_v5 }
  0xef   : > { %2989 = vrot.lane.b32.xlu1 %v2988_v11, %s3384_s9  ;;  %v3038_v11 = vpack.i.bf16 %v2733_v8, %v2732_v7 }
  0xf0   : > { %2994 = vrot.lane.b32.xlu0 %v2993_v21, %s3385_s10 }
  0xf3   : > { %2999 = vrot.lane.b32.xlu1 %v2998_v25, %s3383_s8 }
  0xf4   : > { %3004 = vrot.lane.b32.xlu0 %v3003_v42, %s3384_s9 }
  0xf7   : > { %3009 = vrot.lane.b32.xlu1 %v3008_v43, %s3385_s10 }
  0xf8   : > { %3014 = vrot.lane.b32.xlu0 %v3013_v51, %s3383_s8 }
  0xfb   : > { %3019 = vrot.lane.b32.xlu1 %v3018_v52, %s3384_s9 }
  0xfc   : > { %3024 = vrot.lane.b32.xlu0 %v3023_v2, %s3385_s10 }
  0xff   : > { %3029 = vrot.lane.b32.xlu1 %v3028_v4, %s3383_s8  ;;  %s3391_s8 = smov 96  }
 0x100   : > { %3034 = vrot.lane.b32.xlu0 %v3033_v9, %s3384_s9 }
 0x103   : > { %3039 = vrot.lane.b32.xlu1 %v3038_v11, %s3385_s10 }
 0x129   : > { %v2885_v15 = vpop.permute.xlu0 %2884 }
 0x12a   : > { %v2887_v21 = vunpack.i.h.bf16 %v2885_v15  ;;  %v2886_v25 = vunpack.i.l.bf16 %v2885_v15 }
 0x12d   : > { %v2890_v13 = vpop.permute.xlu1 %2889 }
 0x12e   : > { %v2892_v19 = vunpack.i.h.bf16 %v2890_v13  ;;  %v2891_v26 = vunpack.i.l.bf16 %v2890_v13 }
 0x131   : > { %v2895_v46 = vpop.permute.xlu0 %2894 }
 0x132   : > { %v2897_v55 = vunpack.i.h.bf16 %v2895_v46  ;;  %v2896_v56 = vunpack.i.l.bf16 %v2895_v46 }
 0x135   : > { %v2900_v44 = vpop.permute.xlu1 %2899 }
 0x136   : > { %v2902_v51 = vunpack.i.h.bf16 %v2900_v44  ;;  %v2901_v57 = vunpack.i.l.bf16 %v2900_v44 }
 0x139   : > { %v2905_v13 = vpop.permute.xlu0 %2904 }
 0x13d   : > { %v2910_v9 = vpop.permute.xlu1 %2909 }
 0x15c   : > { %v3793_v12 = vpop.f32.mrf.mxu1 }
 0x15d   : > { %v781_v38 = vsel %vm778_vm8, %v3793_v12, %v2891_v26  ;;  %v2906_v26 = vunpack.i.l.bf16 %v2905_v13 }
 0x15e   : > { %v3795_v16 = vpop.f32.mrf.mxu1 }
 0x15f   : > { %v779_v34 = vsel %vm778_vm8, %v3795_v16, %v2886_v25  ;;  %v2907_v25 = vunpack.i.h.bf16 %v2905_v13 }
 0x160   : > { %v3797_v20 = vpop.f32.mrf.mxu1 }
 0x161   : > { %v782_v30 = vsel %vm778_vm8, %v3797_v20, %v2892_v19  ;;  %v2912_v19 = vunpack.i.h.bf16 %v2910_v9 }
 0x162   : > { %v3801_v31 = vpop.f32.mrf.mxu1  ;;  %v796_v45 = vpack.c.bf16 %v782_v30, %v781_v38  ;;  %v2911_v30 = vunpack.i.l.bf16 %v2910_v9 }
 0x163   : > { %v780_v37 = vsel %vm778_vm8, %v3801_v31, %v2887_v21 }
 0x164   : > { %v3809_v42 = vpop.f32.mrf.mxu1  ;;  %v795_v43 = vpack.c.bf16 %v780_v37, %v779_v34 }
 0x165   : > { %v785_v8 = vsel %vm778_vm8, %v3809_v42, %v2901_v57 }
 0x166   : > { %v3811_v49 = vpop.f32.mrf.mxu1  ;;  %2813 = vmatprep.mubr.msk.bf16.mxu1 %vm823_vm9, %v795_v43 }
 0x167   : > { %4627 = vst [vmem:[#allocation16_spill] sm:$0xff] %v3811_v49  ;;  %2814 = vmatmul.mubr.msk.bf16.vlgmr.msra.gmra.mxu1 %vm823_vm9, %v796_v45  ;;  %v783_v4 = vsel %vm778_vm8, %v3811_v49, %v2896_v56  ;;  %v2915_v56 = vpop.permute.xlu0 %2914 }
 0x168   : > { %v3815_v52 = vpop.f32.mrf.mxu1 }
 0x169   : > { %v786_v2 = vsel %vm778_vm8, %v3815_v52, %v2902_v51  ;;  %v2920_v51 = vpop.permute.xlu1 %2919 }
 0x16a   : > { %v3817_v60 = vpop.f32.mrf.mxu1  ;;  %v798_v11 = vpack.c.bf16 %v786_v2, %v785_v8  ;;  %v2922_v2 = vunpack.i.h.bf16 %v2920_v51  ;;  %v2921_v8 = vunpack.i.l.bf16 %v2920_v51 }
 0x16b   : > { %4628 = vst [vmem:[#allocation17_spill] sm:$0xff] %v3817_v60  ;;  %v784_v5 = vsel %vm778_vm8, %v3817_v60, %v2897_v55 }
 0x16c   : > { %v3825_v6 = vpop.f32.mrf.mxu1  ;;  %v797_v7 = vpack.c.bf16 %v784_v5, %v783_v4  ;;  %v2917_v5 = vunpack.i.h.bf16 %v2915_v56 }
 0x16d   : > { %4629 = vst [vmem:[#allocation18_spill] sm:$0xff] %v3825_v6  ;;  %v789_v46 = vsel %vm778_vm8, %v3825_v6, %v2911_v30  ;;  %v4641_v6 = vmov 3  }
 0x16e   : > { %v3829_v15 = vpop.f32.mrf.mxu1  ;;  %2817 = vmatprep.mubr.msk.bf16.mxu1 %vm823_vm9, %v797_v7  ;;  %v2916_v7 = vunpack.i.l.bf16 %v2915_v56 }
 0x16f   : > { %4630 = vst [vmem:[#allocation19_spill] sm:$0xff] %v3829_v15  ;;  %2818 = vmatmul.mubr.msk.bf16.gmra.mxu1 %vm823_vm9, %v798_v11  ;;  %v787_v38 = vsel %vm778_vm8, %v3829_v15, %v2906_v26 }
 0x170   : > { %v3833_v21 = vpop.f32.mrf.mxu1 }
 0x171   : > { %4631 = vst [vmem:[#allocation20_spill] sm:$0xff] %v3833_v21  ;;  %v790_v37 = vsel %vm778_vm8, %v3833_v21, %v2912_v19 }
 0x172   : > { %v3835_v34 = vpop.f32.mrf.mxu1  ;;  %v800_v55 = vpack.c.bf16 %v790_v37, %v789_v46  ;;  %v4566_v37 = vmov 2  }
 0x173   : > { %4632 = vst [vmem:[#allocation21_spill] sm:$0xff] %v3835_v34  ;;  %v788_v43 = vsel %vm778_vm8, %v3835_v34, %v2907_v25  ;;  %3044 = vset.pattern.permute.xlu1 %v4566_v37 }
 0x174   : > { %v3843_v44 = vpop.f32.mrf.mxu1  ;;  %v799_v45 = vpack.c.bf16 %v788_v43, %v787_v38  ;;  %v4564_v38 = vmov 1   ;;  %v3867_v43 = vpop.permute.xlu0 %2924 }
 0x175   : > { %4633 = vst [vmem:[#allocation22_spill] sm:$0xff] %v3843_v44  ;;  %v793_v26 = vsel %vm778_vm8, %v3843_v44, %v2921_v8  ;;  %3043 = vset.pattern.permute.xlu0 %v4564_v38 }
 0x176   : > { %v3847_v57 = vpop.f32.mrf.mxu1  ;;  %2821 = vmatprep.mubr.msk.bf16.mxu1 %vm823_vm9, %v799_v45 }
 0x177   : > { %4634 = vst [vmem:[#allocation23_spill] sm:$0xff] %v3847_v57  ;;  %2822 = vmatmul.mubr.msk.bf16.gmra.mxu1 %vm823_vm9, %v800_v55  ;;  %v791_v13 = vsel %vm778_vm8, %v3847_v57, %v2916_v7 }
 0x178   : > { %v3851_v4 = vpop.f32.mrf.mxu1  ;;  %v3869_v51 = vpop.permute.xlu0 %2934 }
 0x179   : > { %4635 = vst [vmem:[#allocation24_spill] sm:$0xff] %v3851_v4  ;;  %v794_v11 = vsel %vm778_vm8, %v3851_v4, %v2922_v2  ;;  %v2936_v34 = vunpack.i.l.bf16 %v3869_v51 }
 0x17a   : > { %v3853_v9 = vpop.f32.mrf.mxu1  ;;  %v802_v30 = vpack.c.bf16 %v794_v11, %v793_v26 }
 0x17b   : > { %4636 = vst [vmem:[#allocation25_spill] sm:$0xff] %v3853_v9  ;;  %v792_v19 = vsel %vm778_vm8, %v3853_v9, %v2917_v5 }
 0x17c   : > { %v801_v25 = vpack.c.bf16 %v792_v19, %v791_v13  ;;  %v3871_v7 = vpop.permute.xlu0 %2944 }
 0x17e   : > { %2825 = vmatprep.mubr.msk.bf16.mxu1 %vm823_vm9, %v801_v25 }
 0x17f   : > { %2826 = vmatmul.mubr.msk.bf16.gmra.mxu1 %vm823_vm9, %v802_v30 }
 0x180   : > { %v3873_v26 = vpop.permute.xlu0 %2954 }
 0x227   : > { %v2815_v45 = vpop.f32.mrf.mxu1 }
 0x228   : > { %v2656_v46 = vmul.f32 -1.442695, %v2815_v45 }
 0x229   : > { %v886_v55 = vpop.f32.mrf.mxu1 }
 0x22a   : > { %3274 = vpow2.f32 %v2656_v46  ;;  %v2654_v56 = vmul.f32 -1.442695, %v886_v55 }
 0x22b   : > { %v2816_v2 = vpop.f32.mrf.mxu1 }
 0x22c   : > { %3276 = vpow2.f32 %v2654_v56  ;;  %v2657_v8 = vmul.f32 -1.442695, %v2816_v2  ;;  %v3877_v2 = vpop.permute.xlu0 %2964 }
 0x22d   : > { %v889_v5 = vpop.f32.mrf.mxu1 }
 0x22e   : > { %3278 = vpow2.f32 %v2657_v8  ;;  %v2655_v19 = vmul.f32 -1.442695, %v889_v5  ;;  %v3881_v5 = vpop.permute.xlu1 %2929 }
 0x22f   : > { %v2819_v11 = vpop.f32.mrf.mxu1 }
 0x230   : > { %3280 = vpow2.f32 %v2655_v19  ;;  %v2660_v55 = vmul.f32 -1.442695, %v2819_v11 }
 0x231   : > { %v902_v13 = vpop.f32.mrf.mxu1 }
 0x232   : > { %v2658_v41 = vmul.f32 -1.442695, %v902_v13  ;;  %v2946_v13 = vunpack.i.l.bf16 %v3871_v7 }
 0x233   : > { %v2820_v25 = vpop.f32.mrf.mxu1 }
 0x234   : > { %v2661_v11 = vmul.f32 -1.442695, %v2820_v25 }
 0x235   : > { %v905_v30 = vpop.f32.mrf.mxu1 }
 0x236   : > { %v2659_v45 = vmul.f32 -1.442695, %v905_v30 }
 0x237   : > { %v3275_v35 = vpop.eup %3274  ;;  %v3875_v38 = vpop.f32.mrf.mxu1 }
 0x238   : > { %v999_v46 = vadd.f32 1.0, %v3275_v35  ;;  %3282 = vpow2.f32 %v2659_v45  ;;  %v3885_v45 = vpop.permute.xlu0 %2974 }
 0x239   : > { %v918_v56 = vpop.f32.mrf.mxu1  ;;  %v3277_v3 = vpop.eup %3276 }
 0x23a   : > { %3284 = vrcp.f32 %v999_v46  ;;  %v2662_v37 = vmul.f32 -1.442695, %v918_v56  ;;  %v997_v19 = vadd.f32 1.0, %v3277_v3  ;;  %v3887_v56 = vpop.permute.xlu1 %2939 }
 0x23b   : > { %v3879_v8 = vpop.f32.mrf.mxu1  ;;  %3286 = vpow2.f32 %v2660_v55  ;;  %v3279_v35 = vpop.eup %3278  ;;  %v2941_v3 = vunpack.i.l.bf16 %v3887_v56 }
 0x23c   : > { %3288 = vpow2.f32 %v2662_v37  ;;  %v1000_v44 = vadd.f32 1.0, %v3279_v35  ;;  %v2665_v28 = vmul.f32 -1.442695, %v3879_v8 }
 0x23d   : > { %v921_v30 = vpop.f32.mrf.mxu1  ;;  %3290 = vpow2.f32 %v2658_v41  ;;  %v3281_v37 = vpop.eup %3280 }
 0x23e   : > { %v2663_v59 = vmul.f32 -1.442695, %v921_v30  ;;  %v998_v53 = vadd.f32 1.0, %v3281_v37  ;;  %v3896_v35 = vpop.permute.xlu1 %2949 }
 0x23f   : > { %v3883_v58 = vpop.f32.mrf.mxu1  ;;  %v2951_v57 = vunpack.i.l.bf16 %v3896_v35 }
 0x240   : > { %3292 = vpow2.f32 %v2663_v59  ;;  %v3893_v59 = vpop.permute.xlu0 %2984 }
 0x241   : > { %v934_v46 = vpop.f32.mrf.mxu1  ;;  %3294 = vrcp.f32 %v997_v19 }
 0x242   : > { %v2666_v55 = vmul.f32 -1.442695, %v934_v46  ;;  %3296 = vpow2.f32 %v2661_v11 }
 0x243   : > { %v3889_v4 = vpop.f32.mrf.mxu1 }
 0x244   : > { %3298 = vpow2.f32 %v2666_v55  ;;  %v3900_v37 = vpop.permute.xlu0 %2994 }
 0x245   : > { %v3283_v30 = vpop.eup %3282  ;;  %v937_v41 = vpop.f32.mrf.mxu1  ;;  %3300 = vrcp.f32 %v1000_v44 }
 0x246   : > { %v1002_v25 = vadd.f32 1.0, %v3283_v30  ;;  %v2667_v54 = vmul.f32 -1.442695, %v937_v41  ;;  %v4637_v30 = vmov 0.0  }
 0x247   : > { %v3285_v19 = vpop.eup %3284  ;;  %v2672_v41 = vsel %vm1047_vm10, 1.0, %v4637_v30  ;;  %v2670_v36 = vsel %vm1045_vm11, 1.0, %v4637_v30  ;;  %v2671_v14 = vsel %vm1046_vm15, 1.0, %v4637_v30  ;;  %v2681_v24 = vsel %vm1056_vm1, 1.0, %v4637_v30 }
 0x248   : > { %3302 = vrcp.f32 %v1002_v25  ;;  %v1351_v11 = vmul.f32 %v3285_v19, %v2946_v13  ;;  %v1223_v46 = vmul.f32 %v3285_v19, %v2941_v3  ;;  %v3287_v9 = vpop.eup %3286  ;;  %v1479_v25 = vmul.f32 %v3285_v19, %v2951_v57 }
 0x249   : > { %3304 = vpow2.f32 %v2667_v54  ;;  %v3289_v55 = vpop.eup %3288  ;;  %v1003_v44 = vadd.f32 1.0, %v3287_v9  ;;  %v1095_v39 = vmul.f32 %v3285_v19, %v2672_v41  ;;  %v4594_v3 = vmov 3   ;;  %v3908_v41 = vpop.permute.xlu0 %3004 }
 0x24a   : > { %1697 = vperm.xlu1 %3044, %v1351_v11   ;;  %1601 = vperm.xlu0 %3043, %v1223_v46   ;;  %3306 = vrcp.f32 %v998_v53  ;;  %v1005_v40 = vadd.f32 1.0, %v3289_v55  ;;  %v3291_v63 = vpop.eup %3290  ;;  %v2931_v53 = vunpack.i.l.bf16 %v3881_v5  ;;  %v2926_v9 = vunpack.i.l.bf16 %v3867_v43 }
 0x24b   : > { %v1001_v46 = vadd.f32 1.0, %v3291_v63  ;;  %v2957_v57 = vunpack.i.h.bf16 %v3873_v26  ;;  %v2967_v19 = vunpack.i.h.bf16 %v3877_v2  ;;  %vm3392_vm15 = vmmov 0  }
 0x24c   : > { %3308 = vrcp.f32 %v1005_v40  ;;  %2845 = vmatprep.mubr.msk.bf16.mxu1 %vm3392_vm15, %v4637_v30 }
 0x24d   : > { %v3293_v13 = vpop.eup %3292  ;;  %3310 = vrcp.f32 %v1003_v44  ;;  %v4639_v44 = vmov 2  }
 0x24e   : > { %3045 = vset.pattern.permute.xlu1 %v4594_v3  ;;  %3046 = vset.pattern.permute.xlu0 %v4638_v48  ;;  %v3295_v54 = vpop.eup %3294  ;;  %v1006_v11 = vadd.f32 1.0, %v3293_v13  ;;  %v4640_v13 = vmov 1  }
 0x24f   : > { %1793 = vperm.xlu1 %3045, %v1479_v25   ;;  %1505 = vperm.xlu0 %3046, %v1095_v39   ;;  %v3297_v55 = vpop.eup %3296  ;;  %v1349_v3 = vmul.f32 %v3295_v54, %v2931_v53  ;;  %v1221_v47 = vmul.f32 %v3295_v54, %v2926_v9  ;;  %v2664_v25 = vmul.f32 -1.442695, %v3875_v38  ;;  %v2947_v53 = vunpack.i.h.bf16 %v3871_v7  ;;  %v3919_v9 = vpop.permute.xlu1 %2959 }
 0x250   : > { %3312 = vrcp.f32 %v1006_v11  ;;  %v1004_v63 = vadd.f32 1.0, %v3297_v55  ;;  %v1477_v55 = vmul.f32 %v3295_v54, %v2936_v34  ;;  %v2987_v34 = vunpack.i.h.bf16 %v3893_v59 }
 0x251   : > { %v3299_v40 = vpop.eup %3298  ;;  %3314 = vrcp.f32 %v1001_v46  ;;  %v2996_v46 = vunpack.i.l.bf16 %v3900_v37 }
 0x252   : > { %v1009_v39 = vadd.f32 1.0, %v3299_v40  ;;  %v3913_v15 = vpop.eup %3300 }
 0x253   : > { %3048 = vset.pattern.permute.xlu1 %v4639_v44  ;;  %3047 = vset.pattern.permute.xlu0 %v4640_v13 }
 0x254   : > { %1687 = vperm.xlu1 %3048, %v1349_v3   ;;  %1591 = vperm.xlu0 %3047, %v1221_v47   ;;  %3316 = vrcp.f32 %v1009_v39  ;;  %v1352_v47 = vmul.f32 %v3913_v15, %v2947_v53  ;;  %v3932_v39 = vpop.permute.xlu0 %3014 }
 0x255   : > { %v3915_v11 = vpop.eup %3302  ;;  %3318 = vpow2.f32 %v2664_v25  ;;  %v3940_v25 = vpop.permute.xlu1 %2969 }
 0x256   : > { %v3305_v38 = vpop.eup %3304  ;;  %v3922_v40 = vmul.f32 %v3915_v11, %v2957_v57  ;;  %v3925_v21 = vmul.f32 %v3915_v11, %v2967_v19  ;;  %3320 = vrcp.f32 %v1004_v63  ;;  %v2932_v57 = vunpack.i.h.bf16 %v3881_v5 }
 0x257   : > { %v1010_v3 = vadd.f32 1.0, %v3305_v38  ;;  %v3930_v7 = vpop.eup %3306  ;;  %v2997_v63 = vunpack.i.h.bf16 %v3900_v37  ;;  %v2971_v5 = vunpack.i.l.bf16 %v3940_v25  ;;  %v2942_v37 = vunpack.i.h.bf16 %v3887_v56 }
 0x258   : > { %3049 = vset.pattern.permute.xlu1 %v4641_v6  ;;  %3052 = vset.pattern.permute.xlu0 %v4639_v44  ;;  %v1350_v38 = vmul.f32 %v3930_v7, %v2932_v57  ;;  %v3025_v27 = vpop.permute.xlu0 %3024  ;;  %v2952_v56 = vunpack.i.h.bf16 %v3896_v35 }
 0x259   : > { %3322 = vrcp.f32 %v1010_v3  ;;  %1783 = vperm.xlu1 %3049, %v1477_v55   ;;  %1702 = vperm.xlu0 %3052, %v1352_v47   ;;  %v3938_v19 = vpop.eup %3308  ;;  %v1093_v3 = vmul.f32 %v3295_v54, %v2670_v36  ;;  %v3026_v54 = vunpack.i.l.bf16 %v3025_v27  ;;  %v2956_v36 = vunpack.i.l.bf16 %v3873_v26 }
 0x25a   : > { %v3945_v53 = vmul.f32 %v3938_v19, %v2996_v46  ;;  %v3949_v55 = vpop.eup %3310  ;;  %v1224_v8 = vmul.f32 %v3913_v15, %v2942_v37  ;;  %3324 = vpow2.f32 %v2665_v28  ;;  %v2977_v37 = vunpack.i.h.bf16 %v3885_v45 }
 0x25b   : > { %v1227_v60 = vmul.f32 %v3949_v55, %v2971_v5 }
 0x25d   : > { %3050 = vset.pattern.permute.xlu1 %v4638_v48  ;;  %1692 = vperm.xlu0 %3052, %v1350_v38   ;;  %v3952_v47 = vpop.eup %3312 }
 0x25e   : > { %1495 = vperm.xlu1 %3050, %v1093_v3   ;;  %v3957_v46 = vmul.f32 %v3952_v47, %v2987_v34  ;;  %v3960_v57 = vmul.f32 %v3952_v47, %v2997_v63  ;;  %v3964_v38 = vpop.eup %3314  ;;  %v3017_v34 = vunpack.i.h.bf16 %v3932_v39  ;;  %v3027_v63 = vunpack.i.h.bf16 %v3025_v27 }
 0x25f   : > { %v1225_v49 = vmul.f32 %v3964_v38, %v2956_v36 }
 0x261   : > { %3058 = vset.pattern.permute.xlu0 %v4640_v13  ;;  %v3968_v3 = vpop.eup %3316 }
 0x262   : > { %3051 = vset.pattern.permute.xlu1 %v4640_v13  ;;  %1621 = vperm.xlu0 %3058, %v1227_v60   ;;  %v3974_v26 = vmul.f32 %v3968_v3, %v3026_v54  ;;  %v3319_v5 = vpop.eup %3318  ;;  %v1480_v60 = vmul.f32 %v3913_v15, %v2952_v56  ;;  %v2673_v54 = vsel %vm1048_vm12, 1.0, %v4637_v30  ;;  %v3997_v56 = vpop.permute.xlu1 %2979  ;;  %vm2215_vm12 = vcmask 64512  }
 0x263   : > { %1606 = vperm.xlu1 %3051, %v1224_v8   ;;  %v3977_v33 = vpop.eup %3320  ;;  %v1007_v36 = vadd.f32 1.0, %v3319_v5  ;;  %v2677_v8 = vsel %vm1052_vm13, 1.0, %v4637_v30  ;;  %v2962_v5 = vunpack.i.h.bf16 %v3919_v9  ;;  %vm2181_vm13 = vcmask 523264  }
 0x264   : > { %v1356_v0 = vmul.f32 %v3977_v33, %v2977_v37  ;;  %v1100_v29 = vmul.f32 %v3977_v33, %v2677_v8  ;;  %v2668_v37 = vmul.f32 -1.442695, %v3883_v58 }
 0x265   : > { %3326 = vrcp.f32 %v1007_v36  ;;  %v1354_v36 = vmul.f32 %v3915_v11, %v2962_v5 }
 0x266   : > { %v3981_v28 = vpop.eup %3322  ;;  %1611 = vperm.xlu0 %3058, %v1225_v49   ;;  %v1096_v49 = vmul.f32 %v3913_v15, %v2673_v54  ;;  %v4007_v54 = vpop.permute.xlu1 %2989  ;;  %3328 = vpow2.f32 %v2668_v37 }
 0x267   : > { %v3985_v27 = vmul.f32 %v3981_v28, %v3017_v34  ;;  %v3988_v35 = vmul.f32 %v3981_v28, %v3027_v63  ;;  %3053 = vset.pattern.permute.xlu1 %v4641_v6  ;;  %v2927_v34 = vunpack.i.h.bf16 %v3867_v43  ;;  %v3325_v63 = vpop.eup %3324  ;;  %v2937_v43 = vunpack.i.h.bf16 %v3869_v51 }
 0x268   : > { %1798 = vperm.xlu1 %3053, %v1480_v60   ;;  %v1008_v60 = vadd.f32 1.0, %v3325_v63  ;;  %v2986_v63 = vunpack.i.l.bf16 %v3893_v59 }
 0x269   : > { %v1222_v15 = vmul.f32 %v3930_v7, %v2927_v34  ;;  %v1478_v58 = vmul.f32 %v3930_v7, %v2937_v43  ;;  %v1094_v34 = vmul.f32 %v3930_v7, %v2671_v14  ;;  %v2669_v7 = vmul.f32 -1.442695, %v3889_v4 }
 0x26a   : > { %3066 = vset.pattern.permute.xlu0 %v4639_v44  ;;  %3330 = vrcp.f32 %v1008_v60  ;;  %v3007_v60 = vunpack.i.h.bf16 %v3908_v41 }
 0x26b   : > { %1722 = vperm.xlu0 %3066, %v1356_v0   ;;  %v2675_v0 = vsel %vm1050_vm14, 1.0, %v4637_v30  ;;  %3332 = vpow2.f32 %v2669_v7  ;;  %v2674_v7 = vsel %vm1049_vm3, 1.0, %v4637_v30  ;;  %vm2198_vm14 = vcmask 785408  }
 0x26c   : > { %3054 = vset.pattern.permute.xlu1 %v4638_v48  ;;  %v1098_v51 = vmul.f32 %v3915_v11, %v2675_v0  ;;  %v2676_v0 = vsel %vm1051_vm0, 1.0, %v4637_v30  ;;  %v1097_v10 = vmul.f32 %v3964_v38, %v2674_v7 }
 0x26d   : > { %1510 = vperm.xlu1 %3054, %v1096_v49   ;;  %v4018_v49 = vpop.permute.xlu1 %2999  ;;  %v1099_v14 = vmul.f32 %v3949_v55, %v2676_v0  ;;  %v2982_v0 = vunpack.i.h.bf16 %v3997_v56 }
 0x26e   : > { %v3001_v8 = vunpack.i.l.bf16 %v4018_v49 }
 0x26f   : > { %3068 = vset.pattern.permute.xlu0 %v4638_v48 }
 0x270   : > { %1530 = vperm.xlu0 %3068, %v1100_v29   ;;  %v2976_v29 = vunpack.i.l.bf16 %v3885_v45  ;;  %v1229_v45 = vmul.f32 %v3938_v19, %v2986_v63  ;;  %v2966_v63 = vunpack.i.l.bf16 %v3877_v2 }
 0x271   : > { %3055 = vset.pattern.permute.xlu1 %v4640_v13  ;;  %v4043_v4 = vpop.permute.xlu1 %3009 }
 0x272   : > { %1596 = vperm.xlu1 %3055, %v1222_v15   ;;  %v4023_v62 = vpop.eup %3326  ;;  %v1355_v11 = vmul.f32 %v3949_v55, %v2976_v29  ;;  %v2981_v15 = vunpack.i.l.bf16 %v3997_v56 }
 0x273   : > { %v1231_v5 = vmul.f32 %v4023_v62, %v3001_v8  ;;  %v3329_v37 = vpop.eup %3328  ;;  %v2992_v8 = vunpack.i.h.bf16 %v4007_v54 }
 0x274   : > { %3070 = vset.pattern.permute.xlu0 %v4639_v44  ;;  %v1483_v43 = vmul.f32 %v3949_v55, %v2981_v15  ;;  %v1481_v15 = vmul.f32 %v3964_v38, %v2966_v63 }
 0x275   : > { %1712 = vperm.xlu0 %3070, %v1354_v36   ;;  %v1011_v36 = vadd.f32 1.0, %v3329_v37 }
 0x276   : > { %3056 = vset.pattern.permute.xlu1 %v4641_v6 }
 0x277   : > { %1788 = vperm.xlu1 %3056, %v1478_v58   ;;  %v4037_v59 = vpop.eup %3330  ;;  %3334 = vrcp.f32 %v1011_v36 }
 0x278   : > { %v1360_v58 = vmul.f32 %v4037_v59, %v3007_v60  ;;  %v1104_v1 = vmul.f32 %v4037_v59, %v2681_v24  ;;  %v3333_v55 = vpop.eup %3332  ;;  %v1484_v24 = vmul.f32 %v3977_v33, %v2982_v0 }
 0x279   : > { %3072 = vset.pattern.permute.xlu0 %v4638_v48  ;;  %v1012_v2 = vadd.f32 1.0, %v3333_v55  ;;  %v2991_v55 = vunpack.i.l.bf16 %v4007_v54 }
 0x27a   : > { %1520 = vperm.xlu0 %3072, %v1098_v51   ;;  %v2961_v51 = vunpack.i.l.bf16 %v3919_v9  ;;  %v1358_v9 = vmul.f32 %v3952_v47, %v2992_v8  ;;  %v3006_v8 = vunpack.i.l.bf16 %v3908_v41 }
 0x27b   : > { %3057 = vset.pattern.permute.xlu1 %v4638_v48  ;;  %3336 = vrcp.f32 %v1012_v2 }
 0x27c   : > { %1500 = vperm.xlu1 %3057, %v1094_v34   ;;  %v4054_v34 = vpop.permute.xlu1 %3019  ;;  %v1353_v29 = vmul.f32 %v3964_v38, %v2961_v51  ;;  %v4092_v51 = vpop.permute.xlu0 %3034  ;;  %v1359_v63 = vmul.f32 %v4023_v62, %v3006_v8 }
 0x27d   : > { %v3037_v56 = vunpack.i.h.bf16 %v4092_v51 }
 0x27e   : > { %3073 = vset.pattern.permute.xlu0 %v4640_v13 }
 0x27f   : > { %1641 = vperm.xlu0 %3073, %v1231_v5  }
 0x280   : > { %3059 = vset.pattern.permute.xlu1 %v4639_v44  ;;  %v4063_v5 = vpop.permute.xlu1 %3029 }
 0x281   : > { %1717 = vperm.xlu1 %3059, %v1355_v11   ;;  %v2679_v11 = vsel %vm1054_vm2, 1.0, %v4637_v30 }
 0x282   : > { %v1102_v50 = vmul.f32 %v3952_v47, %v2679_v11  ;;  %v1357_v11 = vmul.f32 %v3938_v19, %v2991_v55 }
 0x283   : > { %1631 = vperm.xlu0 %3073, %v1229_v45   ;;  %v3031_v45 = vunpack.i.l.bf16 %v4063_v5 }
 0x284   : > { %v4073_v37 = vpop.eup %3334  ;;  %v4075_v60 = vpop.permute.xlu1 %3039 }
 0x285   : > { %3060 = vset.pattern.permute.xlu1 %v4641_v6  ;;  %v1235_v47 = vmul.f32 %v4073_v37, %v3031_v45  ;;  %v3041_v36 = vunpack.i.l.bf16 %v4075_v60 }
 0x286   : > { %1813 = vperm.xlu1 %3060, %v1483_v43   ;;  %v2972_v43 = vunpack.i.h.bf16 %v3940_v25  ;;  %v3016_v25 = vunpack.i.l.bf16 %v3932_v39  ;;  %v3022_v39 = vunpack.i.h.bf16 %v4054_v34 }
 0x287   : > { %3081 = vset.pattern.permute.xlu0 %v4639_v44  ;;  %v1491_v38 = vmul.f32 %v4073_v37, %v3041_v36  ;;  %v3036_v36 = vunpack.i.l.bf16 %v4092_v51 }
 0x288   : > { %1742 = vperm.xlu0 %3081, %v1360_v58   ;;  %v1228_v58 = vmul.f32 %v3977_v33, %v2972_v43 }
 0x28a   : > { %3061 = vset.pattern.permute.xlu1 %v4638_v48 }
 0x28b   : > { %1525 = vperm.xlu1 %3061, %v1099_v14   ;;  %v1233_v14 = vmul.f32 %v3968_v3, %v3016_v25  ;;  %v3021_v25 = vunpack.i.l.bf16 %v4054_v34 }
 0x28c   : > { %3083 = vset.pattern.permute.xlu0 %v4638_v48 }
 0x28d   : > { %1550 = vperm.xlu0 %3083, %v1104_v1   ;;  %v4096_v1 = vpop.eup %3336 }
 0x28e   : > { %v1364_v33 = vmul.f32 %v4096_v1, %v3037_v56 }
 0x28f   : > { %3062 = vset.pattern.permute.xlu1 %v4639_v44 }
 0x290   : > { %1707 = vperm.xlu1 %3062, %v1353_v29   ;;  %v1362_v29 = vmul.f32 %v3981_v28, %v3022_v39 }
 0x291   : > { %3085 = vset.pattern.permute.xlu0 %v4639_v44 }
 0x292   : > { %1732 = vperm.xlu0 %3085, %v1358_v9   ;;  %v3011_v9 = vunpack.i.l.bf16 %v4043_v4 }
 0x294   : > { %3063 = vset.pattern.permute.xlu1 %v4641_v6  ;;  %v1487_v41 = vmul.f32 %v4023_v62, %v3011_v9 }
 0x295   : > { %1803 = vperm.xlu1 %3063, %v1481_v15  }
 0x296   : > { %3087 = vset.pattern.permute.xlu0 %v4638_v48 }
 0x297   : > { %1540 = vperm.xlu0 %3087, %v1102_v50   ;;  %v3002_v50 = vunpack.i.h.bf16 %v4018_v49 }
 0x299   : > { %3064 = vset.pattern.permute.xlu1 %v4638_v48  ;;  %v1232_v7 = vmul.f32 %v4037_v59, %v3002_v50 }
 0x29a   : > { %1515 = vperm.xlu1 %3064, %v1097_v10   ;;  %v3012_v10 = vunpack.i.h.bf16 %v4043_v4 }
 0x29b   : > { %3088 = vset.pattern.permute.xlu0 %v4640_v13 }
 0x29c   : > { %1661 = vperm.xlu0 %3088, %v1235_v47  }
 0x29e   : > { %3065 = vset.pattern.permute.xlu1 %v4640_v13 }
 0x29f   : > { %1626 = vperm.xlu1 %3065, %v1228_v58  }
 0x2a0   : > { %3090 = vset.pattern.permute.xlu0 %v4641_v6 }
 0x2a1   : > { %1853 = vperm.xlu0 %3090, %v1491_v38  }
 0x2a3   : > { %3067 = vset.pattern.permute.xlu1 %v4641_v6 }
 0x2a4   : > { %1818 = vperm.xlu1 %3067, %v1484_v24  }
 0x2a5   : > { %3091 = vset.pattern.permute.xlu0 %v4640_v13 }
 0x2a6   : > { %1651 = vperm.xlu0 %3091, %v1233_v14  }
 0x2a8   : > { %3069 = vset.pattern.permute.xlu1 %v4640_v13 }
 0x2a9   : > { %1616 = vperm.xlu1 %3069, %v3922_v40  }
 0x2aa   : > { %3094 = vset.pattern.permute.xlu0 %v4639_v44 }
 0x2ab   : > { %1762 = vperm.xlu0 %3094, %v1364_v33   ;;  %v3032_v33 = vunpack.i.h.bf16 %v4063_v5  ;;  %v3265_v5 = vld [vmem:[%s4561_s6 + $0x38] sm:$0xff]  }
 0x2ac   : > { %2345 = vmatpush1.bf16.msra.mxu0 %v3265_v5 }
 0x2ad   : > { %3071 = vset.pattern.permute.xlu1 %v4641_v6  ;;  %2346 = vmatprep.subr.bf16.mxu0 %v4638_v48 }
 0x2ae   : > { %1808 = vperm.xlu1 %3071, %v3925_v21   ;;  %v2680_v21 = vsel %vm1055_vm4, 1.0, %v4637_v30 }
 0x2af   : > { %1752 = vperm.xlu0 %3094, %v1362_v29   ;;  %v1103_v40 = vmul.f32 %v4023_v62, %v2680_v21  ;;  %v2678_v62 = vsel %vm1053_vm6, 1.0, %v4637_v30  ;;  %v3042_v21 = vunpack.i.h.bf16 %v4075_v60 }
 0x2b0   : > { %v1101_v54 = vmul.f32 %v3938_v19, %v2678_v62 }
 0x2b1   : > { %v1492_v55 = vmul.f32 %v4096_v1, %v3042_v21 }
 0x2b2   : > { %3074 = vset.pattern.permute.xlu1 %v4639_v44 }
 0x2b3   : > { %1737 = vperm.xlu1 %3074, %v1359_v63   ;;  %3179 = vset.pattern.permute.xlu0 %v4638_v48 }
 0x2b7   : > { %3075 = vset.pattern.permute.xlu1 %v4641_v6 }
 0x2b8   : > { %1833 = vperm.xlu1 %3075, %v1487_v41   ;;  %v1236_v41 = vmul.f32 %v4096_v1, %v3032_v33  ;;  %v3272_v33 = vld [vmem:[%s4561_s6] sm:$0xff]  }
 0x2bc   : > { %3076 = vset.pattern.permute.xlu1 %v4638_v48 }
 0x2bd   : > { %1545 = vperm.xlu1 %3076, %v1103_v40  }
 0x2c1   : > { %3077 = vset.pattern.permute.xlu1 %v4639_v44 }
 0x2c2   : > { %1727 = vperm.xlu1 %3077, %v1357_v11  }
 0x2c5   : > { %v4121_v15 = vpop.permute.xlu1 %1697  ;;  %v1602_v19 = vpop.permute.xlu0 %1601 }
 0x2c6   : > { %3078 = vset.pattern.permute.xlu1 %v4641_v6  ;;  %v1671_v58 = vmul.f32 %v3793_v12, %v1602_v19  ;;  %v1895_v24 = vmul.f32 %v3569_v23, %v1602_v19 }
 0x2c7   : > { %1823 = vperm.xlu1 %3078, %v3945_v53   ;;  %v1488_v53 = vmul.f32 %v4037_v59, %v3012_v10 }
 0x2ca   : > { %v4126_v2 = vpop.permute.xlu1 %1793  ;;  %v4144_v47 = vpop.permute.xlu0 %1505 }
 0x2cb   : > { %3079 = vset.pattern.permute.xlu1 %v4638_v48 }
 0x2cc   : > { %1535 = vperm.xlu1 %3079, %v1101_v54  }
 0x2cf   : > { %v4132_v45 = vpop.permute.xlu1 %1687  ;;  %v4156_v51 = vpop.permute.xlu0 %1591 }
 0x2d0   : > { %3080 = vset.pattern.permute.xlu1 %v4640_v13  ;;  %v1893_v29 = vmul.f32 %v3557_v18, %v4156_v51 }
 0x2d1   : > { %1646 = vperm.xlu1 %3080, %v1232_v7   ;;  %v3268_v7 = vld [vmem:[%s4561_s6 + $0x20] sm:$0xff]  }
 0x2d4   : > { %v4137_v43 = vpop.permute.xlu1 %1783  ;;  %v1703_v34 = vpop.permute.xlu0 %1702 }
 0x2d5   : > { %3082 = vset.pattern.permute.xlu1 %v4641_v6  ;;  %v1768_v50 = vmul.f32 %v3797_v20, %v1703_v34 }
 0x2d6   : > { %1838 = vperm.xlu1 %3082, %v1488_v53   ;;  %v1767_v53 = vmul.f32 %v3793_v12, %v4121_v15 }
 0x2d8   : > { %v1693_v63 = vpop.permute.xlu0 %1692 }
 0x2d9   : > { %v4140_v49 = vpop.permute.xlu1 %1495 }
 0x2da   : > { %3084 = vset.pattern.permute.xlu1 %v4640_v13 }
 0x2db   : > { %1636 = vperm.xlu1 %3084, %v3957_v46   ;;  %v1363_v46 = vmul.f32 %v4073_v37, %v3036_v36  ;;  %v1863_v36 = vmul.f32 %v3793_v12, %v4126_v2  ;;  %v1669_v2 = vmul.f32 %v4156_v51, %v3795_v16 }
 0x2dd   : > { %v4177_v11 = vpop.permute.xlu0 %1621 }
 0x2de   : > { %v1607_v4 = vpop.permute.xlu1 %1606 }
 0x2df   : > { %v1672_v59 = vmul.f32 %v3797_v20, %v1607_v4  ;;  %3086 = vset.pattern.permute.xlu1 %v4641_v6  ;;  %v1896_v38 = vmul.f32 %v3566_v22, %v1607_v4  ;;  %v3269_v4 = vld [vmem:[%s4561_s6 + $0x18] sm:$0xff]  }
 0x2e0   : > { %1828 = vperm.xlu1 %3086, %v3960_v57   ;;  %v1361_v57 = vmul.f32 %v3968_v3, %v3021_v25  ;;  %v1766_v25 = vmul.f32 %v1693_v63, %v3801_v31  ;;  %v3273_v63 = vld [vmem:[%s4561_s6 + $0x40] sm:$0xff]  }
 0x2e1   : > { %v3098_v0 = vpack.i.bf16 %v1672_v59, %v1671_v58  ;;  %v3108_v56 = vpack.i.bf16 %v1896_v38, %v1895_v24  ;;  %v4190_v62 = vpop.permute.xlu0 %1611  ;;  %v3271_v24 = vld [vmem:[%s4561_s6 + $0x8] sm:$0xff]  }
 0x2e3   : > { %v1799_v14 = vpop.permute.xlu1 %1798  ;;  %3099 = vrot.lane.b32.xlu0 %v3098_v0, %s3382_s20 }
 0x2e4   : > { %3089 = vset.pattern.permute.xlu1 %v4639_v44 }
 0x2e5   : > { %1757 = vperm.xlu1 %3089, %v1363_v46  }
 0x2e6   : > { %v1723_v19 = vpop.permute.xlu0 %1722 }
 0x2e7   : > { %3109 = vrot.lane.b32.xlu0 %v3108_v56, %s3389_s11 }
 0x2e8   : > { %v4161_v39 = vpop.permute.xlu1 %1510 }
 0x2e9   : > { %1747 = vperm.xlu1 %3089, %v1361_v57  }
 0x2eb   : > { %v4220_v59 = vpop.permute.xlu0 %1530 }
 0x2ed   : > { %v1597_v8 = vpop.permute.xlu1 %1596  ;;  %3092 = vset.pattern.permute.xlu1 %v4641_v6 }
 0x2ee   : > { %v1894_v44 = vmul.f32 %v3554_v17, %v1597_v8  ;;  %1843 = vperm.xlu1 %3092, %v3974_v26   ;;  %v3266_v26 = vld [vmem:[%s4561_s6 + $0x30] sm:$0xff]   ;;  %v1670_v0 = vmul.f32 %v1597_v8, %v3801_v31  ;;  %v1861_v8 = vmul.f32 %v4137_v43, %v3795_v16 }
 0x2ef   : > { %2347 = vmatpush1.bf16.msra.mxu0 %v3266_v26 }
 0x2f0   : > { %v3128_v9 = vpack.i.bf16 %v1894_v44, %v1893_v29  ;;  %2348 = vmatprep.subr.bf16.mxu0 %v4638_v48  ;;  %v3118_v46 = vpack.i.bf16 %v1670_v0, %v1669_v2  ;;  %v1713_v56 = vpop.permute.xlu0 %1712 }
 0x2f2   : > { %v1789_v40 = vpop.permute.xlu1 %1788  ;;  %3093 = vset.pattern.permute.xlu1 %v4640_v13  ;;  %3129 = vrot.lane.b32.xlu0 %v3128_v9, %s3389_s11 }
 0x2f3   : > { %1666 = vperm.xlu1 %3093, %v1236_v41   ;;  %2349 = vmatpush1.bf16.msra.mxu0 %v3267_v61  ;;  %v1862_v57 = vmul.f32 %v1789_v40, %v3801_v31  ;;  %v1772_v41 = vmul.f32 %v3815_v52, %v1723_v19  ;;  %v1675_v40 = vmul.f32 %v3809_v42, %v4177_v11  ;;  %v4642_v61 = vld [vmem:[#allocation7_spill] sm:$0xff] }
 0x2f4   : > { %2350 = vmatprep.subr.bf16.mxu0 %v4638_v48 }
 0x2f5   : > { %v4243_v29 = vpop.permute.xlu0 %1520 }
 0x2f7   : > { %v4182_v60 = vpop.permute.xlu1 %1500  ;;  %3095 = vset.pattern.permute.xlu1 %v4641_v6  ;;  %2351 = vmatpush1.bf16.msra.mxu0 %v3268_v7 }
 0x2f8   : > { %1858 = vperm.xlu1 %3095, %v1492_v55   ;;  %2352 = vmatprep.subr.bf16.mxu0 %v4638_v48 }
 0x2fa   : > { %v4253_v21 = vpop.permute.xlu0 %1641 }
 0x2fb   : > { %2353 = vmatpush1.bf16.msra.mxu0 %v3269_v4 }
 0x2fc   : > { %v1718_v54 = vpop.permute.xlu1 %1717  ;;  %3096 = vset.pattern.permute.xlu1 %v4640_v13  ;;  %v3103_v13 = vpack.i.bf16 %v1768_v50, %v1767_v53  ;;  %2354 = vmatprep.subr.bf16.mxu0 %v4638_v48 }
 0x2fd   : > { %1656 = vperm.xlu1 %3096, %v3985_v27   ;;  %v1864_v27 = vmul.f32 %v3797_v20, %v1799_v14  ;;  %v1765_v14 = vmul.f32 %v4132_v45, %v3795_v16  ;;  %v3133_v45 = vpack.i.bf16 %v1862_v57, %v1861_v8  ;;  %v1771_v44 = vmul.f32 %v3809_v42, %v1718_v54  ;;  %v3339_v57 = vld [vmem:[%s3468_s17 + $0x68] sm:$0xff] }
 0x2fe   : > { %v1899_v54 = vmul.f32 %v4642_v61, %v4177_v11  ;;  %v4263_v7 = vpop.permute.xlu0 %1631  ;;  %vm1058_vm7 = vcmp.eq.s32.totalorder %v3339_v57, 0 }
 0x2ff   : > { %v3113_v15 = vpack.i.bf16 %v1864_v27, %v1863_v36  ;;  %v3123_v51 = vpack.i.bf16 %v1766_v25, %v1765_v14  ;;  %v3143_v43 = vpack.i.bf16 %v1772_v41, %v1771_v44  ;;  %v4643_v27 = vld [vmem:[#allocation16_spill] sm:$0xff]  ;;  %v4646_v14 = vld [vmem:[#allocation6_spill] sm:$0xff] }
 0x300   : > { %v1673_v0 = vmul.f32 %v4190_v62, %v4643_v27 }
 0x301   : > { %v4199_v10 = vpop.permute.xlu1 %1813  ;;  %3097 = vset.pattern.permute.xlu1 %v4641_v6 }
 0x302   : > { %1848 = vperm.xlu1 %3097, %v3988_v35   ;;  %v3270_v35 = vld [vmem:[%s4561_s6 + $0x10] sm:$0xff]   ;;  %v1867_v53 = vmul.f32 %v3809_v42, %v4199_v10 }
 0x303   : > { %2355 = vmatpush1.bf16.msra.mxu0 %v3270_v35  ;;  %v4644_v35 = vld [vmem:[#allocation17_spill] sm:$0xff]  ;;  %v1743_v2 = vpop.permute.xlu0 %1742 }
 0x304   : > { %2356 = vmatprep.subr.bf16.mxu0 %v4638_v48 }
 0x306   : > { %v4212_v58 = vpop.permute.xlu1 %1525  ;;  %3104 = vrot.lane.b32.xlu1 %v3103_v13, %s3390_s26 }
 0x307   : > { %3178 = vset.pattern.permute.xlu1 %v4638_v48  ;;  %2357 = vmatpush1.bf16.msra.mxu0 %v3271_v24 }
 0x308   : > { %2358 = vmatprep.subr.bf16.mxu0 %v4638_v48 }
 0x30a   : > { %3114 = vrot.lane.b32.xlu1 %v3113_v15, %s3391_s8  ;;  %v1770_v15 = vmul.f32 %v1713_v56, %v4644_v35 }
 0x30b   : > { %v1708_v38 = vpop.permute.xlu1 %1707  ;;  %2359 = vmatpush1.bf16.msra.mxu0 %v3272_v33 }
 0x30c   : > { %2374 = vmatprep.subr.bf16.mxu0 %v4638_v48  ;;  %v1769_v4 = vmul.f32 %v1708_v38, %v4643_v27 }
 0x30e   : > { %3119 = vrot.lane.b32.xlu1 %v3118_v46, %s3382_s20  ;;  %v3163_v25 = vpack.i.bf16 %v1770_v15, %v1769_v4  ;;  %v4645_v46 = vld [vmem:[#allocation5_spill] sm:$0xff] }
 0x30f   : > { %2375 = vmatpush2.bf16.msra.mxu0 %v3273_v63  ;;  %v4284_v63 = vpop.permute.xlu0 %1550  ;;  %v4649_v15 = vld [vmem:[#allocation21_spill] sm:$0xff] }
 0x310   : > { %v1804_v34 = vpop.permute.xlu1 %1803 }
 0x311   : > { %v1865_v33 = vmul.f32 %v1804_v34, %v4643_v27  ;;  %v4647_v34 = vld [vmem:[#allocation18_spill] sm:$0xff] }
 0x312   : > { %3124 = vrot.lane.b32.xlu1 %v3123_v51, %s3390_s26  ;;  %v1897_v51 = vmul.f32 %v4646_v14, %v4190_v62 }
 0x315   : > { %v4249_v9 = vpop.permute.xlu1 %1515 }
 0x316   : > { %3134 = vrot.lane.b32.xlu1 %v3133_v45, %s3391_s8  ;;  %v3340_v45 = vld [vmem:[%s3468_s17 + $0x60] sm:$0xff] }
 0x317   : > { %vm1057_vm9 = vcmp.eq.s32.totalorder %v3340_v45, 0 }
 0x318   : > { %v2682_v62 = vsel %vm1057_vm9, 1.0, %v4637_v30 }
 0x31a   : > { %v1627_v48 = vpop.permute.xlu1 %1626  ;;  %3144 = vrot.lane.b32.xlu1 %v3143_v43, %s3390_s26  ;;  %v2683_v43 = vsel %vm1058_vm7, 1.0, %v4637_v30 }
 0x31b   : > { %v1676_v5 = vmul.f32 %v3815_v52, %v1627_v48  ;;  %v1900_v26 = vmul.f32 %v3588_v32, %v1627_v48 }
 0x31d   : > { %v3138_v55 = vpack.i.bf16 %v1676_v5, %v1675_v40  ;;  %v3148_v13 = vpack.i.bf16 %v1900_v26, %v1899_v54  ;;  %v1106_v40 = vmul.f32 %v3981_v28, %v2683_v43  ;;  %v4648_v26 = vld [vmem:[#allocation20_spill] sm:$0xff] }
 0x31e   : > { %v1776_v54 = vmul.f32 %v4648_v26, %v1743_v2 }
 0x31f   : > { %v1819_v50 = vpop.permute.xlu1 %1818  ;;  %3139 = vrot.lane.b32.xlu0 %v3138_v55, %s3382_s20  ;;  %v1105_v55 = vmul.f32 %v3968_v3, %v2682_v62 }
 0x320   : > { %v1868_v19 = vmul.f32 %v3815_v52, %v1819_v50  ;;  %v1733_v50 = vpop.permute.xlu0 %1732 }
 0x321   : > { %v1774_v28 = vmul.f32 %v1733_v50, %v4649_v15  ;;  %v4653_v50 = vld [vmem:[#allocation8_spill] sm:$0xff] }
 0x322   : > { %v3153_v36 = vpack.i.bf16 %v1868_v19, %v1867_v53 }
 0x323   : > { %3149 = vrot.lane.b32.xlu0 %v3148_v13, %s3389_s11 }
 0x324   : > { %v1617_v11 = vpop.permute.xlu1 %1616  ;;  %3154 = vrot.lane.b32.xlu1 %v3153_v36, %s3391_s8  ;;  %v4295_v13 = vpop.permute.xlu0 %1540 }
 0x325   : > { %v1674_v10 = vmul.f32 %v1617_v11, %v4644_v35  ;;  %v1898_v24 = vmul.f32 %v4645_v46, %v1617_v11 }
 0x327   : > { %v3158_v38 = vpack.i.bf16 %v1674_v10, %v1673_v0  ;;  %v3168_v44 = vpack.i.bf16 %v1898_v24, %v1897_v51  ;;  %v4650_v0 = vld [vmem:[#allocation19_spill] sm:$0xff] }
 0x328   : > { %3164 = vrot.lane.b32.xlu1 %v3163_v25, %s3390_s26  ;;  %v4300_v11 = vpop.permute.xlu0 %1661 }
 0x329   : > { %v1809_v56 = vpop.permute.xlu1 %1808  ;;  %3159 = vrot.lane.b32.xlu0 %v3158_v38, %s3382_s20 }
 0x32a   : > { %v1866_v8 = vmul.f32 %v1809_v56, %v4644_v35  ;;  %v1679_v56 = vmul.f32 %v4647_v34, %v4253_v21 }
 0x32c   : > { %v3173_v41 = vpack.i.bf16 %v1866_v8, %v1865_v33  ;;  %v4304_v2 = vpop.permute.xlu0 %1853  ;;  %v4651_v8 = vld [vmem:[#allocation10_spill] sm:$0xff] }
 0x32d   : > { %3169 = vrot.lane.b32.xlu0 %v3168_v44, %s3389_s11 }
 0x32e   : > { %v1738_v48 = vpop.permute.xlu1 %1737  ;;  %3174 = vrot.lane.b32.xlu1 %v3173_v41, %s3391_s8  ;;  %v4652_v41 = vld [vmem:[#allocation11_spill] sm:$0xff] }
 0x32f   : > { %v1775_v5 = vmul.f32 %v4647_v34, %v1738_v48  ;;  %v1903_v43 = vmul.f32 %v4652_v41, %v4253_v21  ;;  %v4654_v21 = vld [vmem:[#allocation9_spill] sm:$0xff] }
 0x330   : > { %v4308_v38 = vpop.permute.xlu0 %1651 }
 0x331   : > { %1560 = vperm.xlu0 %3179, %v1106_v40   ;;  %v3185_v19 = vpack.i.bf16 %v1776_v54, %v1775_v5 }
 0x332   : > { %1555 = vperm.xlu1 %3178, %v1105_v55   ;;  %v1677_v55 = vmul.f32 %v4263_v7, %v4650_v0 }
 0x333   : > { %v1834_v53 = vpop.permute.xlu1 %1833 }
 0x334   : > { %v4314_v44 = vpop.permute.xlu0 %1762 }
 0x336   : > { %3186 = vrot.lane.b32.xlu1 %v3185_v19, %s3390_s26 }
 0x338   : > { %v4297_v4 = vpop.permute.xlu1 %1545  ;;  %v1753_v40 = vpop.permute.xlu0 %1752 }
 0x33d   : > { %v1728_v36 = vpop.permute.xlu1 %1727 }
 0x33e   : > { %v1773_v3 = vmul.f32 %v1728_v36, %v4650_v0 }
 0x340   : > { %v3200_v10 = vpack.i.bf16 %v1774_v28, %v1773_v3  ;;  %v1901_v3 = vmul.f32 %v4654_v21, %v4263_v7  ;;  %v1871_v7 = vmul.f32 %v4647_v34, %v1834_v53  ;;  %v1877_v53 = vmul.f32 %v3557_v18, %v4140_v49 }
 0x342   : > { %v1824_v25 = vpop.permute.xlu1 %1823  ;;  %3201 = vrot.lane.b32.xlu1 %v3200_v10, %s3390_s26 }
 0x347   : > { %v4306_v24 = vpop.permute.xlu1 %1535 }
 0x34c   : > { %v1647_v51 = vpop.permute.xlu1 %1646 }
 0x34d   : > { %v1680_v57 = vmul.f32 %v4648_v26, %v1647_v51  ;;  %v1904_v45 = vmul.f32 %v4651_v8, %v1647_v51  ;;  %v3341_v51 = vld [vmem:[%s3468_s17 + $0x78] sm:$0xff] }
 0x34e   : > { %vm1060_vm10 = vcmp.eq.s32.totalorder %v3341_v51, 0 }
 0x34f   : > { %v3180_v33 = vpack.i.bf16 %v1680_v57, %v1679_v56  ;;  %v3190_v48 = vpack.i.bf16 %v1904_v45, %v1903_v43  ;;  %v1869_v56 = vmul.f32 %v1824_v25, %v4650_v0 }
 0x351   : > { %v1839_v62 = vpop.permute.xlu1 %1838  ;;  %3181 = vrot.lane.b32.xlu0 %v3180_v33, %s3382_s20 }
 0x352   : > { %v1872_v45 = vmul.f32 %v4648_v26, %v1839_v62 }
 0x355   : > { %3191 = vrot.lane.b32.xlu0 %v3190_v48, %s3389_s11  ;;  %v4324_v28 = vpop.permute.xlu0 %3099  ;;  %v2685_v48 = vsel %vm1060_vm10, 1.0, %v4637_v30 }
 0x356   : > { %v1637_v5 = vpop.permute.xlu1 %1636  ;;  %v1108_v25 = vmul.f32 %v4096_v1, %v2685_v48  ;;  %v4656_v48 = vld [vmem:[#allocation25_spill] sm:$0xff] }
 0x357   : > { %v1678_v54 = vmul.f32 %v1637_v5, %v4649_v15  ;;  %v1902_v19 = vmul.f32 %v4653_v50, %v1637_v5 }
 0x359   : > { %v3195_v36 = vpack.i.bf16 %v1678_v54, %v1677_v55  ;;  %v3205_v33 = vpack.i.bf16 %v1902_v19, %v1901_v3  ;;  %v4336_v5 = vpop.permute.xlu0 %3109  ;;  %v3342_v54 = vld [vmem:[%s3468_s17 + $0x70] sm:$0xff] }
 0x35a   : > { %vm1059_vm11 = vcmp.eq.s32.totalorder %v3342_v54, 0 }
 0x35b   : > { %v1829_v10 = vpop.permute.xlu1 %1828  ;;  %3196 = vrot.lane.b32.xlu0 %v3195_v36, %s3382_s20  ;;  %v3215_v36 = vpack.i.bf16 %v1872_v45, %v1871_v7  ;;  %v2684_v62 = vsel %vm1059_vm11, 1.0, %v4637_v30  ;;  %v1778_v7 = vmul.f32 %v1753_v40, %v4656_v48  ;;  %v4658_v40 = vld [vmem:[#allocation13_spill] sm:$0xff] }
 0x35c   : > { %v1870_v57 = vmul.f32 %v1829_v10, %v4649_v15  ;;  %v1878_v10 = vmul.f32 %v3554_v17, %v4182_v60  ;;  %v1107_v1 = vmul.f32 %v4073_v37, %v2684_v62 }
 0x35e   : > { %v3210_v43 = vpack.i.bf16 %v1870_v57, %v1869_v56  ;;  %v4655_v57 = vld [vmem:[#allocation23_spill] sm:$0xff] }
 0x35f   : > { %3206 = vrot.lane.b32.xlu0 %v3205_v33, %s3389_s11  ;;  %v1681_v37 = vmul.f32 %v4308_v38, %v4655_v57 }
 0x360   : > { %v1758_v55 = vpop.permute.xlu1 %1757  ;;  %3211 = vrot.lane.b32.xlu1 %v3210_v43, %s3391_s8 }
 0x363   : > { %1570 = vperm.xlu0 %3179, %v1108_v25  }
 0x364   : > { %v1748_v19 = vpop.permute.xlu1 %1747  ;;  %v3130_v3 = vpop.permute.xlu0 %3129  ;;  %3216 = vrot.lane.b32.xlu1 %v3215_v36, %s3391_s8 }
 0x365   : > { %v3132_v51 = vunpack.i.h.bf16 %v3130_v3  ;;  %v3131_v56 = vunpack.i.l.bf16 %v3130_v3  ;;  %v1777_v33 = vmul.f32 %v1748_v19, %v4655_v57  ;;  %v4657_v3 = vld [vmem:[#allocation12_spill] sm:$0xff] }
 0x367   : > { %v2216_v45 = vsel %vm2215_vm12, %v1877_v53, %v3131_v56  ;;  %v2217_v43 = vsel %vm2215_vm12, %v1878_v10, %v3132_v51  ;;  %3260 = vset.pattern.permute.xlu0 %v4641_v6  ;;  %v3225_v25 = vpack.i.bf16 %v1778_v7, %v1777_v33  ;;  %v1905_v10 = vmul.f32 %v4658_v40, %v4308_v38  ;;  %v4660_v7 = vld [vmem:[#allocation22_spill] sm:$0xff] }
 0x368   : > { %1565 = vperm.xlu1 %3178, %v1107_v1   ;;  %v2233_v18 = vpack.c.bf16 %v2217_v43, %v2216_v45  ;;  %v4659_v1 = vld [vmem:[#allocation24_spill] sm:$0xff] }
 0x369   : > { %v1844_v54 = vpop.permute.xlu1 %1843  ;;  %v1780_v38 = vmul.f32 %v4659_v1, %v4314_v44 }
 0x36a   : > { %2743 = vmatprep.mubr.msk.bf16.mxu0 %vm592_vm5, %v2233_v18  ;;  %v1873_v56 = vmul.f32 %v1844_v54, %v4655_v57  ;;  %v1779_v18 = vmul.f32 %v4660_v7, %v1758_v55  ;;  %v4662_v55 = vld [vmem:[#allocation15_spill] sm:$0xff] }
 0x36c   : > { %3226 = vrot.lane.b32.xlu1 %v3225_v25, %s3390_s26 }
 0x36e   : > { %v1667_v17 = vpop.permute.xlu1 %1666 }
 0x36f   : > { %v1684_v45 = vmul.f32 %v4659_v1, %v1667_v17 }
 0x373   : > { %v1859_v36 = vpop.permute.xlu1 %1858 }
 0x378   : > { %v1657_v19 = vpop.permute.xlu1 %1656 }
 0x379   : > { %v1682_v62 = vmul.f32 %v1657_v19, %v4656_v48  ;;  %v1906_v6 = vmul.f32 %v4657_v3, %v1657_v19  ;;  %v1683_v19 = vmul.f32 %v4660_v7, %v4300_v11 }
 0x37b   : > { %v3220_v53 = vpack.i.bf16 %v1682_v62, %v1681_v37  ;;  %v3230_v43 = vpack.i.bf16 %v1906_v6, %v1905_v10  ;;  %v3235_v54 = vpack.i.bf16 %v1684_v45, %v1683_v19  ;;  %v4661_v62 = vld [vmem:[#allocation14_spill] sm:$0xff]  ;;  %v1876_v6 = vmul.f32 %v4659_v1, %v1859_v36 }
 0x37c   : > { %v1907_v10 = vmul.f32 %v4662_v55, %v4300_v11  ;;  %v1879_v11 = vmul.f32 %v3569_v23, %v4144_v47  ;;  %v3112_v36 = vunpack.i.h.bf16 %v4336_v5  ;;  %v1576_v19 = vmul.f32 %v3797_v20, %v4161_v39 }
 0x37d   : > { %v1849_v51 = vpop.permute.xlu1 %1848  ;;  %3221 = vrot.lane.b32.xlu0 %v3220_v53, %s3382_s20  ;;  %v1908_v53 = vmul.f32 %v4661_v62, %v1667_v17  ;;  %v1575_v17 = vmul.f32 %v3793_v12, %v4144_v47  ;;  %v1580_v12 = vmul.f32 %v3815_v52, %v4220_v59  ;;  %v1883_v20 = vmul.f32 %v4642_v61, %v4212_v58 }
 0x37e   : > { %v1874_v33 = vmul.f32 %v1849_v51, %v4656_v48  ;;  %v3245_v51 = vpack.i.bf16 %v1780_v38, %v1779_v18  ;;  %v3111_v18 = vunpack.i.l.bf16 %v4336_v5  ;;  %v1884_v5 = vmul.f32 %v3588_v32, %v4220_v59 }
 0x37f   : > { %v3250_v44 = vpack.i.bf16 %v1908_v53, %v1907_v10  ;;  %v1880_v53 = vmul.f32 %v3566_v22, %v4161_v39 }
 0x380   : > { %v3240_v25 = vpack.i.bf16 %v1874_v33, %v1873_v56  ;;  %v1875_v33 = vmul.f32 %v4660_v7, %v4304_v2 }
 0x381   : > { %v4368_v37 = vpop.permute.xlu1 %3104  ;;  %3231 = vrot.lane.b32.xlu0 %v3230_v43, %s3389_s11  ;;  %v2219_v22 = vsel %vm2215_vm12, %v1880_v53, %v3112_v36 }
 0x382   : > { %3241 = vrot.lane.b32.xlu1 %v3240_v25, %s3391_s8  ;;  %v3255_v43 = vpack.i.bf16 %v1876_v6, %v1875_v33  ;;  %v1573_v25 = vmul.f32 %v4140_v49, %v3795_v16  ;;  %v1579_v16 = vmul.f32 %v3809_v42, %v4212_v58  ;;  %v2218_v49 = vsel %vm2215_vm12, %v1879_v11, %v3111_v18 }
 0x383   : > { %v3101_v42 = vunpack.i.l.bf16 %v4324_v28  ;;  %v3107_v61 = vunpack.i.h.bf16 %v4368_v37  ;;  %v3106_v33 = vunpack.i.l.bf16 %v4368_v37 }
 0x385   : > { %v4378_v56 = vpop.permute.xlu1 %3114  ;;  %3236 = vrot.lane.b32.xlu0 %v3235_v54, %s3382_s20  ;;  %v2167_v37 = vsel %vm778_vm8, %v1575_v17, %v3101_v42 }
 0x386   : > { %3246 = vrot.lane.b32.xlu1 %v3245_v51, %s3390_s26  ;;  %v1574_v51 = vmul.f32 %v4182_v60, %v3801_v31  ;;  %v3102_v60 = vunpack.i.h.bf16 %v4324_v28  ;;  %v3117_v11 = vunpack.i.h.bf16 %v4378_v56  ;;  %v3116_v36 = vunpack.i.l.bf16 %v4378_v56 }
 0x389   : > { %v3120_v45 = vpop.permute.xlu1 %3119  ;;  %3251 = vrot.lane.b32.xlu0 %v3250_v44, %s3389_s11 }
 0x38a   : > { %3256 = vrot.lane.b32.xlu1 %v3255_v43, %s3391_s8  ;;  %v3122_v38 = vunpack.i.h.bf16 %v3120_v45  ;;  %v3121_v54 = vunpack.i.l.bf16 %v3120_v45  ;;  %v2235_v45 = vpack.c.bf16 %v2219_v22, %v2218_v49  ;;  %v2184_v49 = vsel %vm2181_vm13, %v2167_v37, %v3106_v33 }
 0x38c   : > { %v2166_v6 = vsel %vm778_vm8, %v1574_v51, %v3122_v38  ;;  %v2165_v32 = vsel %vm778_vm8, %v1573_v25, %v3121_v54 }
 0x38d   : > { %v3125_v2 = vpop.permute.xlu1 %3124 }
 0x38e   : > { %v3127_v23 = vunpack.i.h.bf16 %v3125_v2  ;;  %v3126_v47 = vunpack.i.l.bf16 %v3125_v2 }
 0x390   : > { %v2182_v10 = vsel %vm2181_vm13, %v2165_v32, %v3126_v47  ;;  %v2183_v58 = vsel %vm2181_vm13, %v2166_v6, %v3127_v23  ;;  %v2168_v23 = vsel %vm778_vm8, %v1576_v19, %v3102_v60  ;;  %v2201_v32 = vsel %vm2198_vm14, %v2184_v49, %v3116_v36 }
 0x391   : > { %v3140_v52 = vpop.permute.xlu0 %3139  ;;  %v3135_v39 = vpop.permute.xlu1 %3134  ;;  %v2185_v22 = vsel %vm2181_vm13, %v2168_v23, %v3107_v61  ;;  %v1881_v36 = vmul.f32 %v4646_v14, %v4249_v9 }
 0x392   : > { %v3137_v59 = vunpack.i.h.bf16 %v3135_v39  ;;  %v3136_v31 = vunpack.i.l.bf16 %v3135_v39  ;;  %v3142_v25 = vunpack.i.h.bf16 %v3140_v52  ;;  %v3141_v38 = vunpack.i.l.bf16 %v3140_v52 }
 0x393   : > { %v2202_v19 = vsel %vm2198_vm14, %v2185_v22, %v3117_v11  ;;  %v1882_v11 = vmul.f32 %v4645_v46, %v4243_v29 }
 0x394   : > { %v2199_v44 = vsel %vm2198_vm14, %v2182_v10, %v3136_v31  ;;  %v2200_v43 = vsel %vm2198_vm14, %v2183_v58, %v3137_v59  ;;  %v2172_v17 = vsel %vm778_vm8, %v1580_v12, %v3142_v25  ;;  %v2171_v59 = vsel %vm778_vm8, %v1579_v16, %v3141_v38 }
 0x395   : > { %v3150_v18 = vpop.permute.xlu0 %3149  ;;  %v3145_v2 = vpop.permute.xlu1 %3144  ;;  %v2232_v28 = vpack.c.bf16 %v2200_v43, %v2199_v44  ;;  %v2234_v43 = vpack.c.bf16 %v2202_v19, %v2201_v32  ;;  %v1578_v12 = vmul.f32 %v4243_v29, %v4644_v35  ;;  %v1577_v16 = vmul.f32 %v4249_v9, %v4643_v27 }
 0x396   : > { %v3152_v54 = vunpack.i.h.bf16 %v3150_v18  ;;  %v3151_v53 = vunpack.i.l.bf16 %v3150_v18  ;;  %v3147_v47 = vunpack.i.h.bf16 %v3145_v2  ;;  %v3146_v51 = vunpack.i.l.bf16 %v3145_v2 }
 0x397   : > { %2377 = vmatmul.mubr.bf16.vlgmr.msra.gmra.mxu0 %v2232_v28  ;;  %v1888_v32 = vmul.f32 %v4651_v8, %v4284_v63  ;;  %v1887_v19 = vmul.f32 %v4652_v41, %v4297_v4  ;;  %v1581_v8 = vmul.f32 %v4306_v24, %v4650_v0  ;;  %v1584_v41 = vmul.f32 %v4648_v26, %v4284_v63 }
 0x398   : > { %v2223_v56 = vsel %vm2215_vm12, %v1884_v5, %v3152_v54  ;;  %v2222_v39 = vsel %vm2215_vm12, %v1883_v20, %v3151_v53  ;;  %2744 = vmatprep.mubr.msk.bf16.mxu0 %vm592_vm5, %v2235_v45  ;;  %v2189_v42 = vsel %vm2181_vm13, %v2172_v17, %v3147_v47  ;;  %v2188_v5 = vsel %vm2181_vm13, %v2171_v59, %v3146_v51 }
 0x399   : > { %v2239_v52 = vpack.c.bf16 %v2223_v56, %v2222_v39  ;;  %v3155_v6 = vpop.permute.xlu1 %3154  ;;  %v1583_v63 = vmul.f32 %v4647_v34, %v4297_v4 }
 0x39a   : > { %v3157_v31 = vunpack.i.h.bf16 %v3155_v6  ;;  %v3156_v60 = vunpack.i.l.bf16 %v3155_v6 }
 0x39b   : > { %v3160_v10 = vpop.permute.xlu0 %3159 }
 0x39c   : > { %v3162_v20 = vunpack.i.h.bf16 %v3160_v10  ;;  %v3161_v58 = vunpack.i.l.bf16 %v3160_v10  ;;  %v2205_v61 = vsel %vm2198_vm14, %v2188_v5, %v3156_v60  ;;  %v2206_v33 = vsel %vm2198_vm14, %v2189_v42, %v3157_v31 }
 0x39d   : > { %v3165_v44 = vpop.permute.xlu1 %3164  ;;  %v2238_v45 = vpack.c.bf16 %v2206_v33, %v2205_v61  ;;  %v1582_v61 = vmul.f32 %v4295_v13, %v4649_v15 }
 0x39e   : > { %v3167_v18 = vunpack.i.h.bf16 %v3165_v44  ;;  %v3166_v2 = vunpack.i.l.bf16 %v3165_v44  ;;  %v2170_v25 = vsel %vm778_vm8, %v1578_v12, %v3162_v20  ;;  %v2169_v38 = vsel %vm778_vm8, %v1577_v16, %v3161_v58 }
 0x39f   : > { %v3170_v28 = vpop.permute.xlu0 %3169  ;;  %2385 = vmatmul.mubr.bf16.gmra.mxu0 %v2234_v43  ;;  %v1886_v44 = vmul.f32 %v4653_v50, %v4295_v13  ;;  %v1885_v43 = vmul.f32 %v4654_v21, %v4306_v24 }
 0x3a0   : > { %v3172_v54 = vunpack.i.h.bf16 %v3170_v28  ;;  %v3171_v53 = vunpack.i.l.bf16 %v3170_v28  ;;  %v2187_v46 = vsel %vm2181_vm13, %v2170_v25, %v3167_v18  ;;  %v2186_v9 = vsel %vm2181_vm13, %v2169_v38, %v3166_v2 }
 0x3a1   : > { %v3175_v35 = vpop.permute.xlu1 %3174 }
 0x3a2   : > { %v2221_v23 = vsel %vm2215_vm12, %v1882_v11, %v3172_v54  ;;  %v2220_v27 = vsel %vm2215_vm12, %v1881_v36, %v3171_v53  ;;  %v3177_v37 = vunpack.i.h.bf16 %v3175_v35  ;;  %v3176_v29 = vunpack.i.l.bf16 %v3175_v35 }
 0x3a3   : > { %v2237_v14 = vpack.c.bf16 %v2221_v23, %v2220_v27 }
 0x3a4   : > { %v2203_v47 = vsel %vm2198_vm14, %v2186_v9, %v3176_v29  ;;  %v2204_v51 = vsel %vm2198_vm14, %v2187_v46, %v3177_v37 }
 0x3a5   : > { %2745 = vmatprep.mubr.msk.bf16.mxu0 %vm592_vm5, %v2237_v14  ;;  %v2236_v22 = vpack.c.bf16 %v2204_v51, %v2203_v47 }
 0x3a7   : > { %2393 = vmatmul.mubr.bf16.gmra.mxu0 %v2236_v22 }
 0x3a8   : > { %2746 = vmatprep.mubr.msk.bf16.mxu0 %vm592_vm5, %v2239_v52 }
 0x3ac   : > { %v4455_v49 = vpop.permute.xlu0 %1560 }
 0x3ad   : > { %v4457_v56 = vpop.permute.xlu1 %1555 }
 0x3af   : > { %2401 = vmatmul.mubr.bf16.gmra.mxu0 %v2238_v45 }
 0x3b1   : > { %v3187_v17 = vpop.permute.xlu1 %3186 }
 0x3b2   : > { %v3189_v34 = vunpack.i.h.bf16 %v3187_v17  ;;  %v3188_v4 = vunpack.i.l.bf16 %v3187_v17 }
 0x3b5   : > { %v3202_v10 = vpop.permute.xlu1 %3201 }
 0x3b6   : > { %v3204_v15 = vunpack.i.h.bf16 %v3202_v10  ;;  %v3203_v36 = vunpack.i.l.bf16 %v3202_v10 }
 0x3c3   : > { %v3182_v39 = vpop.permute.xlu0 %3181 }
 0x3c4   : > { %v3184_v33 = vunpack.i.h.bf16 %v3182_v39  ;;  %v3183_v45 = vunpack.i.l.bf16 %v3182_v39 }
 0x3c6   : > { %v2176_v26 = vsel %vm778_vm8, %v1584_v41, %v3184_v33  ;;  %v2175_v38 = vsel %vm778_vm8, %v1583_v63, %v3183_v45 }
 0x3c7   : > { %v3192_v6 = vpop.permute.xlu0 %3191  ;;  %v2192_v46 = vsel %vm2181_vm13, %v2175_v38, %v3188_v4  ;;  %v2193_v9 = vsel %vm2181_vm13, %v2176_v26, %v3189_v34 }
 0x3c8   : > { %v3194_v59 = vunpack.i.h.bf16 %v3192_v6  ;;  %v3193_v31 = vunpack.i.l.bf16 %v3192_v6 }
 0x3ca   : > { %v2227_v60 = vsel %vm2215_vm12, %v1888_v32, %v3194_v59  ;;  %v2226_v52 = vsel %vm2215_vm12, %v1887_v19, %v3193_v31  ;;  %v1586_v59 = vmul.f32 %v4455_v49, %v4656_v48  ;;  %v1585_v31 = vmul.f32 %v4457_v56, %v4655_v57 }
 0x3cb   : > { %v2243_v42 = vpack.c.bf16 %v2227_v60, %v2226_v52  ;;  %v1890_v60 = vmul.f32 %v4657_v3, %v4455_v49  ;;  %v1889_v52 = vmul.f32 %v4658_v40, %v4457_v56 }
 0x3cd   : > { %v3197_v5 = vpop.permute.xlu0 %3196 }
 0x3ce   : > { %v3199_v20 = vunpack.i.h.bf16 %v3197_v5  ;;  %v3198_v58 = vunpack.i.l.bf16 %v3197_v5 }
 0x3d0   : > { %v2174_v12 = vsel %vm778_vm8, %v1582_v61, %v3199_v20  ;;  %v2173_v16 = vsel %vm778_vm8, %v1581_v8, %v3198_v58 }
 0x3d1   : > { %v3207_v11 = vpop.permute.xlu0 %3206  ;;  %v2190_v28 = vsel %vm2181_vm13, %v2173_v16, %v3203_v36  ;;  %v2191_v25 = vsel %vm2181_vm13, %v2174_v12, %v3204_v15 }
 0x3d2   : > { %v3209_v18 = vunpack.i.h.bf16 %v3207_v11  ;;  %v3208_v0 = vunpack.i.l.bf16 %v3207_v11  ;;  %v3212_v2 = vpop.permute.xlu1 %3211 }
 0x3d3   : > { %v3214_v13 = vunpack.i.h.bf16 %v3212_v2  ;;  %v3213_v50 = vunpack.i.l.bf16 %v3212_v2 }
 0x3d4   : > { %v2225_v24 = vsel %vm2215_vm12, %v1886_v44, %v3209_v18  ;;  %v2224_v21 = vsel %vm2215_vm12, %v1885_v43, %v3208_v0 }
 0x3d5   : > { %v2241_v54 = vpack.c.bf16 %v2225_v24, %v2224_v21  ;;  %v2207_v53 = vsel %vm2198_vm14, %v2190_v28, %v3213_v50  ;;  %v2208_v35 = vsel %vm2198_vm14, %v2191_v25, %v3214_v13 }
 0x3d6   : > { %v3217_v23 = vpop.permute.xlu1 %3216  ;;  %v2240_v27 = vpack.c.bf16 %v2208_v35, %v2207_v53 }
 0x3d7   : > { %v3219_v37 = vunpack.i.h.bf16 %v3217_v23  ;;  %v3218_v29 = vunpack.i.l.bf16 %v3217_v23  ;;  %2747 = vmatprep.mubr.msk.bf16.mxu0 %vm592_vm5, %v2241_v54 }
 0x3d8   : > { %2409 = vmatmul.mubr.bf16.gmra.mxu0 %v2240_v27 }
 0x3d9   : > { %2748 = vmatprep.mubr.msk.bf16.mxu0 %vm592_vm5, %v2243_v42  ;;  %v2209_v14 = vsel %vm2198_vm14, %v2192_v46, %v3218_v29  ;;  %v2210_v47 = vsel %vm2198_vm14, %v2193_v9, %v3219_v37 }
 0x3da   : > { %v2242_v51 = vpack.c.bf16 %v2210_v47, %v2209_v14 }
 0x3de   : > { %v1571_v39 = vpop.permute.xlu0 %1570 }
 0x3df   : > { %v1588_v36 = vmul.f32 %v4659_v1, %v1571_v39  ;;  %v1892_v50 = vmul.f32 %v4661_v62, %v1571_v39 }
 0x3e0   : > { %2417 = vmatmul.mubr.bf16.gmra.mxu0 %v2242_v51 }
 0x3e3   : > { %v1566_v22 = vpop.permute.xlu1 %1565 }
 0x3e4   : > { %v1587_v18 = vmul.f32 %v4660_v7, %v1566_v22  ;;  %v1891_v24 = vmul.f32 %v4662_v55, %v1566_v22 }
 0x3e7   : > { %v3227_v32 = vpop.permute.xlu1 %3226 }
 0x3e8   : > { %v3229_v20 = vunpack.i.h.bf16 %v3227_v32  ;;  %v3228_v58 = vunpack.i.l.bf16 %v3227_v32 }
 0x3ef   : > { %v3222_v6 = vpop.permute.xlu0 %3221 }
 0x3f0   : > { %v3224_v19 = vunpack.i.h.bf16 %v3222_v6  ;;  %v3223_v17 = vunpack.i.l.bf16 %v3222_v6 }
 0x3f2   : > { %v2178_v42 = vsel %vm778_vm8, %v1586_v59, %v3224_v19  ;;  %v2177_v5 = vsel %vm778_vm8, %v1585_v31, %v3223_v17 }
 0x3f3   : > { %v3232_v10 = vpop.permute.xlu0 %3231  ;;  %v2194_v3 = vsel %vm2181_vm13, %v2177_v5, %v3228_v58  ;;  %v2195_v40 = vsel %vm2181_vm13, %v2178_v42, %v3229_v20 }
 0x3f4   : > { %v3234_v61 = vunpack.i.h.bf16 %v3232_v10  ;;  %v3233_v8 = vunpack.i.l.bf16 %v3232_v10  ;;  %v3242_v33 = vpop.permute.xlu1 %3241 }
 0x3f5   : > { %v3244_v48 = vunpack.i.h.bf16 %v3242_v33  ;;  %v3243_v41 = vunpack.i.l.bf16 %v3242_v33 }
 0x3f6   : > { %v2229_v57 = vsel %vm2215_vm12, %v1890_v60, %v3234_v61  ;;  %v2228_v44 = vsel %vm2215_vm12, %v1889_v52, %v3233_v8 }
 0x3f7   : > { %v2245_v49 = vpack.c.bf16 %v2229_v57, %v2228_v44  ;;  %v3237_v56 = vpop.permute.xlu0 %3236  ;;  %v2211_v43 = vsel %vm2198_vm14, %v2194_v3, %v3243_v41  ;;  %v2212_v45 = vsel %vm2198_vm14, %v2195_v40, %v3244_v48 }
 0x3f8   : > { %v3239_v12 = vunpack.i.h.bf16 %v3237_v56  ;;  %v3238_v16 = vunpack.i.l.bf16 %v3237_v56  ;;  %v3247_v11 = vpop.permute.xlu1 %3246  ;;  %v2244_v15 = vpack.c.bf16 %v2212_v45, %v2211_v43 }
 0x3f9   : > { %2749 = vmatprep.mubr.msk.bf16.mxu0 %vm592_vm5, %v2245_v49  ;;  %v3249_v0 = vunpack.i.h.bf16 %v3247_v11  ;;  %v3248_v2 = vunpack.i.l.bf16 %v3247_v11 }
 0x3fa   : > { %2425 = vmatmul.mubr.bf16.gmra.mxu0 %v2244_v15  ;;  %v2180_v63 = vsel %vm778_vm8, %v1588_v36, %v3239_v12  ;;  %v2179_v26 = vsel %vm778_vm8, %v1587_v18, %v3238_v16  ;;  %v4663_v15 = vlaneseq }
 0x3fb   : > { %v3252_v13 = vpop.permute.xlu0 %3251  ;;  %v2196_v7 = vsel %vm2181_vm13, %v2179_v26, %v3248_v2  ;;  %v2197_v54 = vsel %vm2181_vm13, %v2180_v63, %v3249_v0  ;;  %v2751_v0 = vld [vmem:[%s312_s30] ss:$0 sm:$0xff]  ;;  %v3393_v2 = vmov 1.0|1.0  }
 0x3fc   : > { %v3254_v21 = vunpack.i.h.bf16 %v3252_v13  ;;  %v3253_v28 = vunpack.i.l.bf16 %v3252_v13  ;;  %v3257_v25 = vpop.permute.xlu1 %3256  ;;  %v2442_v36 = vshrl.u32 %v4663_v15, 7  ;;  %v2455_v63 = vld [vmem:[#allocation2] sm:$0xff] }
 0x3fd   : > { %v3259_v1 = vunpack.i.h.bf16 %v3257_v25  ;;  %v3258_v38 = vunpack.i.l.bf16 %v3257_v25 }
 0x3fe   : > { %v2231_v53 = vsel %vm2215_vm12, %v1892_v50, %v3254_v21  ;;  %v2230_v35 = vsel %vm2215_vm12, %v1891_v24, %v3253_v28  ;;  %v2443_v18 = vadd.s32 8, %v2442_v36  ;;  %v2456_v24 = vld [vmem:[#allocation2 + $0x8] sm:$0xff] }
 0x3ff   : > { %v2247_v34 = vpack.c.bf16 %v2231_v53, %v2230_v35  ;;  %v2213_v4 = vsel %vm2198_vm14, %v2196_v7, %v3258_v38  ;;  %v2214_v62 = vsel %vm2198_vm14, %v2197_v54, %v3259_v1 }
 0x400   : > { %v2246_v23 = vpack.c.bf16 %v2214_v62, %v2213_v4  ;;  %vm2449_vm0 = vcmp.eq.s32.totalorder %v2443_v18, %v2751_v0 }
 0x401   : > { %2750 = vmatprep.mubr.msk.bf16.mxu0 %vm592_vm5, %v2247_v34  ;;  %vm2448_vm5 = vcmp.eq.s32.totalorder %v2442_v36, %v2751_v0 }
 0x402   : > { %2433 = vmatmul.mubr.bf16.gmra.mxu0 %v2246_v23  ;;  %vm2754_vm1 = vmpackc.low %vm2449_vm0, %vm2448_vm5 }
 0x457   : > { %v2378_v55 = vpop.f32.mrf.mxu0 }
 0x459   : > { %v2380_v27 = vpop.f32.mrf.mxu0 }
 0x45b   : > { %v2381_v37 = vpop.f32.mrf.mxu0 }
 0x45c   : > { %v2457_v29 = vpack.c.bf16 %v2381_v37, %v2378_v55 }
 0x45d   : > { %v2383_v46 = vpop.f32.mrf.mxu0 }
 0x45f   : > { %v2386_v9 = vpop.f32.mrf.mxu0 }
 0x461   : > { %v2388_v14 = vpop.f32.mrf.mxu0 }
 0x463   : > { %v2389_v47 = vpop.f32.mrf.mxu0 }
 0x464   : > { %v2458_v51 = vpack.c.bf16 %v2389_v47, %v2386_v9 }
 0x465   : > { %v2391_v22 = vpop.f32.mrf.mxu0 }
 0x467   : > { %v2394_v39 = vpop.f32.mrf.mxu0 }
 0x469   : > { %v2396_v6 = vpop.f32.mrf.mxu0 }
 0x46b   : > { %v2397_v32 = vpop.f32.mrf.mxu0 }
 0x46c   : > { %v2459_v19 = vpack.c.bf16 %v2397_v32, %v2394_v39 }
 0x46d   : > { %v2399_v17 = vpop.f32.mrf.mxu0 }
 0x46f   : > { %v2402_v59 = vpop.f32.mrf.mxu0 }
 0x471   : > { %v2404_v31 = vpop.f32.mrf.mxu0 }
 0x473   : > { %v2405_v60 = vpop.f32.mrf.mxu0 }
 0x474   : > { %v2460_v52 = vpack.c.bf16 %v2405_v60, %v2402_v59 }
 0x475   : > { %v2407_v42 = vpop.f32.mrf.mxu0 }
 0x498   : > { %v2410_v5 = vpop.f32.mrf.mxu0 }
 0x49a   : > { %v2412_v10 = vpop.f32.mrf.mxu0 }
 0x49c   : > { %v2413_v20 = vpop.f32.mrf.mxu0 }
 0x49d   : > { %v2461_v11 = vpack.c.bf16 %v2413_v20, %v2410_v5 }
 0x49e   : > { %v2415_v58 = vpop.f32.mrf.mxu0 }
 0x4a0   : > { %v2418_v61 = vpop.f32.mrf.mxu0 }
 0x4a2   : > { %v2420_v8 = vpop.f32.mrf.mxu0 }
 0x4a4   : > { %v2421_v33 = vpop.f32.mrf.mxu0 }
 0x4a5   : > { %v2462_v16 = vpack.c.bf16 %v2421_v33, %v2418_v61 }
 0x4a6   : > { %v2423_v48 = vpop.f32.mrf.mxu0 }
 0x4ba   : > { %v2426_v41 = vpop.f32.mrf.mxu0 }
 0x4bc   : > { %v2428_v57 = vpop.f32.mrf.mxu0 }
 0x4be   : > { %v2429_v44 = vpop.f32.mrf.mxu0 }
 0x4bf   : > { %v2463_v12 = vpack.c.bf16 %v2429_v44, %v2426_v41 }
 0x4c0   : > { %v2431_v3 = vpop.f32.mrf.mxu0 }
 0x4c2   : > { %v2434_v40 = vpop.f32.mrf.mxu0 }
 0x4c4   : > { %v2436_v49 = vpop.f32.mrf.mxu0 }
 0x4c6   : > { %v2437_v56 = vpop.f32.mrf.mxu0 }
 0x4c7   : > { %v2464_v43 = vpack.c.bf16 %v2437_v56, %v2434_v40 }
 0x4c8   : > { %v2439_v45 = vpop.f32.mrf.mxu0 }
 0x4c9   : > { %2830 = vmatpush3.bf16.msra.mxu1 %v2464_v43 }
 0x4ca   : > { %2831 = vmatprep.subr.bf16.mxu1 %v4637_v30 }
 0x4cd   : > { %2832 = vmatpush3.bf16.msra.mxu1 %v2463_v12 }
 0x4ce   : > { %2833 = vmatprep.subr.bf16.mxu1 %v4637_v30 }
 0x4d1   : > { %2834 = vmatpush3.bf16.msra.mxu1 %v2462_v16 }
 0x4d2   : > { %2835 = vmatprep.subr.bf16.mxu1 %v4637_v30 }
 0x4d5   : > { %2836 = vmatpush3.bf16.msra.mxu1 %v2461_v11 }
 0x4d6   : > { %2837 = vmatprep.subr.bf16.mxu1 %v4637_v30 }
 0x4d9   : > { %2838 = vmatpush3.bf16.msra.mxu1 %v2460_v52 }
 0x4da   : > { %2839 = vmatprep.subr.bf16.mxu1 %v4637_v30 }
 0x4dd   : > { %2840 = vmatpush3.bf16.msra.mxu1 %v2459_v19 }
 0x4de   : > { %2841 = vmatprep.subr.bf16.mxu1 %v4637_v30 }
 0x4e1   : > { %2842 = vmatpush3.bf16.msra.mxu1 %v2458_v51 }
 0x4e2   : > { %2843 = vmatprep.subr.bf16.mxu1 %v4637_v30 }
 0x4e5   : > { %2844 = vmatpush3.bf16.msra.mxu1 %v2457_v29 }
 0x4e8   : > { %2846 = vmatmul.mubr.msk.bf16.vlgmr.msra.gmra.mxu1 %vm2754_vm1, %v3393_v2 }
 0x5a8   : > { %v2499_v26 = vpop.f32.mrf.mxu1 }
 0x5a9   : > { %v2506_v13 = vadd.f32 %v2499_v26, %v2455_v63 }
 0x5aa   : > { %v2847_v50 = vpop.f32.mrf.mxu1 }
 0x5ab   : > { %2508 = vst.msk [vmem:[#allocation2] sm:$0xff] %vm778_vm8, %v2506_v13 }
 0x5ac   : > { %v2502_v21 = vpop.f32.mrf.mxu1 }
 0x5ad   : > { %v2507_v30 = vadd.f32 %v2502_v21, %v2456_v24 }
 0x5ae   : > { %v2848_v28 = vpop.f32.mrf.mxu1 }
 0x5af   : > { %2509 = vst.msk [vmem:[#allocation2 + $0x8] sm:$0xff] %vm778_vm8, %v2507_v30 }
 0x5b0   : > { %3356 = shalt.err (!%p3353_p13)
}
 0x5b1   : > { %s3395_s30 = smov 128  }
 0x5b2   : > { %2851 = dma.vmem_to_hbm [thread:$0]  (%p2854_p6), %s2517_s18, 256, %s4562_s7, [#allocation3], %s3395_s30, %s3395_s30, %s3389_s11  }
 0x5b3   : > { %3372 = dma.done.wait (%p2854_p6), [#allocation3], 256  }
 0x5b4   : > { %3374 = vsyncadd (%p2854_p6), [#allocation3], 4294967040 }
 0x5b5 PF: > { %s18_s24 = sadd.s32 1, %s3377_s24  }
 0x5b6   : > { %p15_p0 = scmp.ge.s32.totalorder %s18_s24, 4  }
 0x5b8   :  { %17 = sbr.rel (!%p15_p0) target bundleno = 1 (0x1), region = 88 }
 0x5bd   :  { %2532 = vsyncpa [#allocation3], 1 }
 0x5be   :  { %2534 = vsyncpa [#allocation3 + $0x1], 1 }

</bundles_post_ra>
